<compile_context>
chip_gen: v6e
topology: v6e:2x2x1
jax: 0.10.0
libtpu: 0.0.40
codegen_flags: <defaults>
</compile_context>

<pallas_src>
import functools

import jax
import jax.numpy as jnp
import numpy as np
from jax.experimental import pallas as pl
from jax.experimental.pallas import tpu as pltpu


# ----------------------------------------------------------------------------
# Fused kernel: merged bidirectional GRU recurrence + attention, one invocation.
# ----------------------------------------------------------------------------
def _encoder_kernel(x_ref, w_ref, att_ref, mask_ref, out_ref, *, B, S, D, H, OUT_W):
    H2, H4, H6 = 2 * H, 4 * H, 6 * H
    D2 = 2 * D

    # ---- unpack the packed operand slabs (static, 8-row-aligned slices) ----
    w_in = w_ref[0:D2, :]                    # (2D, 6H) block-diag input gate weights
    whh = w_ref[D2:D2 + H2, :]               # (2H, 6H) block-diag hidden gate weights
    bih = w_ref[D2 + H2:D2 + H2 + 1, :]      # (1, 6H)  input bias (+ folded r/z b_hh)

    awT = att_ref[0:H2, :]                   # (2H, 2H) attention transform (pre-T'd)
    ab = att_ref[H2:H2 + 1, :]               # (1, 2H)  attention bias
    u = att_ref[H2 + 1:H2 + 2, :]            # (1, 2H)  context vector
    bhhn = att_ref[H2 + 2:H2 + 3, :]         # (1, 2H)  n-gate hidden bias [fwd | bwd]

    # ---- hoisted input-side gates: all steps, all gates, both directions ----
    # Row t*B + b holds lanes [r_f r_b z_f z_b n_f n_b] built from x[b, t] (fwd
    # lanes of x) and x[b, S-1-t] (bwd lanes of x).
    gx = jnp.dot(x_ref[...], w_in, preferred_element_type=jnp.float32) + bih  # (S*B, 6H)

    # ---- merged fwd/bwd recurrence: step t = fwd time t paired with bwd time S-1-t
    h = jnp.zeros((B, H2), jnp.float32)      # [h_fwd | h_bwd]
    outs = []
    for t in range(S):
        r0 = t * B
        gx_t = gx[r0:r0 + B, :]              # (B, 6H) contiguous aligned row slice
        m_t = mask_ref[r0:r0 + B, :]         # (B, 2H) 0/1 validity [fwd(t) | bwd(S-1-t)]
        if t == 0:
            a_rz = gx_t[:, 0:H4]             # h == 0  =>  gh == 0, skip the matmul
            gh_n = bhhn
        else:
            gh = jnp.dot(h, whh, preferred_element_type=jnp.float32)   # (B, 6H)
            a_rz = gx_t[:, 0:H4] + gh[:, 0:H4]
            gh_n = gh[:, H4:H6] + bhhn
        rz = jax.nn.sigmoid(a_rz)            # one sigmoid over r & z of both directions
        r, z = rz[:, 0:H2], rz[:, H2:H4]
        n = jnp.tanh(gx_t[:, H4:H6] + r * gh_n)
        h_new = n + z * (h - n)              # == (1 - z) * n + z * h
        outs.append(h_new * m_t)             # zero outputs past the length
        h = h + m_t * (h_new - h)            # freeze h past the length

    # ---- attention epilogue ----
    # outs[t]: lanes 0:H = fwd output @ time t, lanes H:2H = bwd output @ time S-1-t.
    P = jnp.concatenate(outs, axis=0)          # (S*B, 2H) fwd half already time-major
    Prev = jnp.concatenate(outs[::-1], axis=0)  # (S*B, 2H) bwd half time-major in lanes H:2H
    lane = jax.lax.broadcasted_iota(jnp.int32, (S * B, H2), 1)
    G = jnp.where(lane < H, P, Prev)           # time-major [fwd(s) | bwd(s)] (lane select only)

    uit = jnp.tanh(jnp.dot(G, awT, preferred_element_type=jnp.float32) + ab)   # (S*B, 2H)
    sv = jnp.sum(uit * u, axis=1, keepdims=True)                               # (S*B, 1)
    scores = jnp.concatenate([sv[s * B:(s + 1) * B, :] for s in range(S)], axis=1)  # (B, S)
    scores = scores + mask_ref[S * B:S * B + B, 0:S]       # additive -1e30 length mask

    mmax = jnp.max(scores, axis=1, keepdims=True)
    e = jnp.exp(scores - mmax)
    alpha = e * pl.reciprocal(jnp.sum(e, axis=1, keepdims=True), approx=True)  # (B, S)

    weighted = G[0:B, :] * alpha[:, 0:1]
    for s in range(1, S):
        weighted = weighted + G[s * B:(s + 1) * B, :] * alpha[:, s:s + 1]      # (B, 2H)

    # Single lane-dense output slab: [weighted | alpha | zero pad] -> one unmasked store.
    pieces = [weighted, alpha]
    if OUT_W > H2 + S:
        pieces.append(jnp.zeros((B, OUT_W - H2 - S), jnp.float32))
    out_ref[...] = jnp.concatenate(pieces, axis=1)


# ----------------------------------------------------------------------------
# Parameter init (deterministic, PyTorch-style uniform(-1/sqrt(fan), 1/sqrt(fan)))
# ----------------------------------------------------------------------------
def init_params(key, input_dim, hidden_dim):
    D, H = input_dim, hidden_dim
    H2 = 2 * H
    keys = jax.random.split(key, 11)
    kg = 1.0 / np.sqrt(H)
    ka = 1.0 / np.sqrt(H2)

    def u(kk, shape, scale):
        return jax.random.uniform(kk, shape, jnp.float32, -scale, scale)

    params = {}
    for i, d in enumerate(["fwd", "bwd"]):
        params[d] = dict(
            w_ih=u(keys[4 * i + 0], (3 * H, D), kg),
            w_hh=u(keys[4 * i + 1], (3 * H, H), kg),
            b_ih=u(keys[4 * i + 2], (3 * H,), kg),
            b_hh=u(keys[4 * i + 3], (3 * H,), kg),
        )
    params["att_w"] = u(keys[8], (H2, H2), ka)   # nn.Linear(2H, 2H).weight
    params["att_b"] = u(keys[9], (H2,), ka)      # nn.Linear(2H, 2H).bias
    params["ctx_w"] = u(keys[10], (1, H2), ka)   # nn.Linear(2H, 1, bias=False).weight
    return params


# ----------------------------------------------------------------------------
# Wrapper: operand packing in plain JAX, everything else in one Pallas call.
# ----------------------------------------------------------------------------
def _gate(w, i, H):
    return w[i * H:(i + 1) * H]


def _pack_block_diag(wf, wb, H):
    """PyTorch (3H, X) fwd/bwd gate weights -> (2X, 6H) block-diag.
    Lane order [r_f r_b z_f z_b n_f n_b]; row blocks = [fwd-input rows | bwd-input rows]."""
    X = wf.shape[1]
    z = jnp.zeros((X, H), jnp.float32)
    cols = []
    for gi in range(3):                                    # gi: 0=r, 1=z, 2=n
        cols.append(jnp.concatenate([_gate(wf, gi, H).T, z], axis=0))
        cols.append(jnp.concatenate([z, _gate(wb, gi, H).T], axis=0))
    return jnp.concatenate(cols, axis=1)


def sentence_encoder(params, sentence_vectors, doc_lengths):
    """sentence_vectors: (B, S, D) batch-first.  Returns (doc_vec (B, 2H), alpha (B, S))."""
    B, S, D = sentence_vectors.shape
    H = params["fwd"]["w_hh"].shape[1]
    H2, H3 = 2 * H, 3 * H
    B_pad = ((B + 7) // 8) * 8                             # f32 sublane tile
    out_w = max(128, ((H2 + S + 127) // 128) * 128)        # lane-dense output width
    assert S <= H2, "mask-slab packing assumes S <= 2*hidden_dim"

    # lengths: clamp(min=1) like the PyTorch module; pad rows get length 1.
    lengths = jnp.clip(doc_lengths, 1).astype(jnp.int32)
    lengths = jnp.pad(lengths, (0, B_pad - B), constant_values=1)

    # ---- slab 1: time-major x with the time-reversed copy packed in extra lanes ----
    x = jnp.pad(sentence_vectors.astype(jnp.float32), ((0, B_pad - B), (0, 0), (0, 0)))
    x_tm = jnp.transpose(x, (1, 0, 2))                     # (S, B_pad, D)
    x_dbl = jnp.concatenate([x_tm, x_tm[::-1]], axis=-1)   # lanes [x_t | x_{S-1-t}]
    x_dbl = x_dbl.reshape(S * B_pad, 2 * D)

    # ---- slab 2: block-diag gate weights + folded input-side bias ----
    pf, pb = params["fwd"], params["bwd"]
    w_in_bd = _pack_block_diag(pf["w_ih"], pb["w_ih"], H)  # (2D, 6H)
    w_hh_bd = _pack_block_diag(pf["w_hh"], pb["w_hh"], H)  # (2H, 6H)
    bfi, bbi, bfh, bbh = pf["b_ih"], pb["b_ih"], pf["b_hh"], pb["b_hh"]
    bih_all = jnp.concatenate([
        bfi[0:H] + bfh[0:H],    bbi[0:H] + bbh[0:H],       # r  (b_hh folded in)
        bfi[H:H2] + bfh[H:H2],  bbi[H:H2] + bbh[H:H2],     # z  (b_hh folded in)
        bfi[H2:H3],             bbi[H2:H3],                # n  (b_hh stays inside r*(...))
    ]).reshape(1, 6 * H)
    w_slab = jnp.concatenate([w_in_bd, w_hh_bd, bih_all], axis=0)   # (2D+2H+1, 6H)

    # ---- slab 3: attention weights + n-gate hidden bias ----
    bhh_n = jnp.concatenate([bfh[H2:H3], bbh[H2:H3]]).reshape(1, H2)
    att_slab = jnp.concatenate([
        params["att_w"].T,                                 # (2H, 2H)
        params["att_b"].reshape(1, H2),
        params["ctx_w"].reshape(1, H2),
        bhh_n,
    ], axis=0)                                             # (2H+3, 2H)

    # ---- slab 4: per-step validity masks + additive attention mask ----
    t_idx = jnp.arange(S)
    vf = (t_idx[None, :] < lengths[:, None]).astype(jnp.float32)    # (B_pad, S) valid(b, t)
    vb = vf[:, ::-1]                                                # valid(b, S-1-t)
    step_mask = jnp.concatenate([
        jnp.broadcast_to(vf.T[:, :, None], (S, B_pad, H)),
        jnp.broadcast_to(vb.T[:, :, None], (S, B_pad, H)),
    ], axis=-1).reshape(S * B_pad, H2)
    score_mask = jnp.where(vf > 0.0, 0.0, -1e30).astype(jnp.float32)
    score_mask = jnp.pad(score_mask, ((0, 0), (0, H2 - S)))
    mask_slab = jnp.concatenate([step_mask, score_mask], axis=0)    # (S*B_pad+B_pad, 2H)

    kernel = functools.partial(_encoder_kernel, B=B_pad, S=S, D=D, H=H, OUT_W=out_w)
    vmem = pl.BlockSpec(memory_space=pltpu.MemorySpace.VMEM)
    out = pl.pallas_call(
        kernel,
        out_shape=jax.ShapeDtypeStruct((B_pad, out_w), jnp.float32),
        in_specs=[vmem, vmem, vmem, vmem],
        out_specs=vmem,
    )(x_dbl, w_slab, att_slab, mask_slab)

    weighted = out[:B, 0:H2]
    alpha = out[:B, H2:H2 + S]
    return weighted, alpha


# ----------------------------------------------------------------------------
# Pure NumPy reference (mirrors the PyTorch module semantics) for validation.
# ----------------------------------------------------------------------------
def ref_forward(params, x, doc_lengths):
    x = np.asarray(x, np.float32)
    B, S, D = x.shape
    H = int(params["fwd"]["w_hh"].shape[1])
    lengths = np.clip(np.asarray(doc_lengths), 1, None)

    def cell(p, xt, h):
        wih, whh = np.asarray(p["w_ih"]), np.asarray(p["w_hh"])
        bih, bhh = np.asarray(p["b_ih"]), np.asarray(p["b_hh"])
        gx = xt @ wih.T + bih
        gh = h @ whh.T + bhh
        r = 1.0 / (1.0 + np.exp(-(gx[:, :H] + gh[:, :H])))
        z = 1.0 / (1.0 + np.exp(-(gx[:, H:2 * H] + gh[:, H:2 * H])))
        n = np.tanh(gx[:, 2 * H:] + r * gh[:, 2 * H:])
        return (1.0 - z) * n + z * h

    def run(p, time_order):
        out = np.zeros((B, S, H), np.float32)
        h = np.zeros((B, H), np.float32)
        for t in time_order:
            h_new = cell(p, x[:, t], h)
            valid = (t < lengths)[:, None]
            h = np.where(valid, h_new, h)
            out[:, t] = np.where(valid, h_new, 0.0)
        return out

    g = np.concatenate([run(params["fwd"], range(S)),
                        run(params["bwd"], range(S - 1, -1, -1))], axis=-1)

    W, b, u = (np.asarray(params["att_w"]), np.asarray(params["att_b"]),
               np.asarray(params["ctx_w"]))
    uit = np.tanh(g @ W.T + b)
    scores = (uit @ u.T)[:, :, 0]
    mask = np.arange(S)[None, :] >= lengths[:, None]
    scores = np.where(mask, -np.inf, scores)
    m = scores.max(axis=1, keepdims=True)
    e = np.exp(scores - m)
    alpha = e / e.sum(axis=1, keepdims=True)
    weighted = (g * alpha[:, :, None]).sum(axis=1)
    return weighted.astype(np.float32), alpha.astype(np.float32)


if __name__ == "__main__":
    B, S, D, H = 2, 8, 16, 32
    key = jax.random.PRNGKey(0)
    kx, kp = jax.random.split(key)

    sentence_vectors = jax.random.normal(kx, (B, S, D), jnp.float32)
    doc_lengths = jnp.array([8, 5], jnp.int32)   # max(lengths) == S
    params = init_params(kp, D, H)

    weighted, alpha = jax.jit(sentence_encoder)(params, sentence_vectors, doc_lengths)
    jax.block_until_ready((weighted, alpha))

    ref_w, ref_a = ref_forward(params, sentence_vectors, doc_lengths)
    # Tolerance covers the approximate EUP reciprocal used for the softmax denominator.
    np.testing.assert_allclose(np.asarray(alpha), ref_a, rtol=2e-3, atol=2e-3)
    np.testing.assert_allclose(np.asarray(weighted), ref_w, rtol=2e-3, atol=2e-3)

    print("KERNEL_OK")
</pallas_src>

<mosaic_0001>
module attributes {stable_mosaic.version = 11 : i64} {
  func.func @_encoder_kernel(%arg0: memref<64x32xf32, #tpu.memory_space<vmem>>, %arg1: memref<97x192xf32, #tpu.memory_space<vmem>>, %arg2: memref<67x64xf32, #tpu.memory_space<vmem>>, %arg3: memref<72x64xf32, #tpu.memory_space<vmem>>, %arg4: memref<8x128xf32, #tpu.memory_space<vmem>>) attributes {dimension_semantics = [], scalar_prefetch = 0 : i64, scratch_operands = 0 : i64, tpu.core_type = #tpu.core_type<tc>} {
    %c0 = arith.constant 0 : index
    %c0_0 = arith.constant 0 : index
    %0 = vector.load %arg1[%c0, %c0_0] : memref<97x192xf32, #tpu.memory_space<vmem>>, vector<32x192xf32>
    %c32 = arith.constant 32 : index
    %c0_1 = arith.constant 0 : index
    %1 = vector.load %arg1[%c32, %c0_1] : memref<97x192xf32, #tpu.memory_space<vmem>>, vector<64x192xf32>
    %c96 = arith.constant 96 : index
    %c0_2 = arith.constant 0 : index
    %2 = vector.load %arg1[%c96, %c0_2] : memref<97x192xf32, #tpu.memory_space<vmem>>, vector<1x192xf32>
    %c0_3 = arith.constant 0 : index
    %c0_4 = arith.constant 0 : index
    %3 = vector.load %arg2[%c0_3, %c0_4] : memref<67x64xf32, #tpu.memory_space<vmem>>, vector<64x64xf32>
    %c64 = arith.constant 64 : index
    %c0_5 = arith.constant 0 : index
    %4 = vector.load %arg2[%c64, %c0_5] : memref<67x64xf32, #tpu.memory_space<vmem>>, vector<1x64xf32>
    %c65 = arith.constant 65 : index
    %c0_6 = arith.constant 0 : index
    %5 = vector.load %arg2[%c65, %c0_6] : memref<67x64xf32, #tpu.memory_space<vmem>>, vector<1x64xf32>
    %c66 = arith.constant 66 : index
    %c0_7 = arith.constant 0 : index
    %6 = vector.load %arg2[%c66, %c0_7] : memref<67x64xf32, #tpu.memory_space<vmem>>, vector<1x64xf32>
    %c0_8 = arith.constant 0 : index
    %c0_9 = arith.constant 0 : index
    %7 = vector.load %arg0[%c0_8, %c0_9] : memref<64x32xf32, #tpu.memory_space<vmem>>, vector<64x32xf32>
    %cst = arith.constant dense<0.000000e+00> : vector<64x192xf32>
    %8 = tpu.matmul %7, %0, %cst {dimension_numbers = #tpu.dot_dimension_numbers<[1], [0], [0], [1], [0, 0, 1, 1], [], []>} : vector<64x32xf32>, vector<32x192xf32>, vector<64x192xf32> -> vector<64x192xf32>
    %9 = vector.broadcast %2 : vector<1x192xf32> to vector<64x192xf32>
    %10 = arith.addf %8, %9 : vector<64x192xf32>
    %cst_10 = arith.constant 0.000000e+00 : f32
    %11 = vector.broadcast %cst_10 : f32 to vector<8x64xf32>
    %12 = vector.extract_strided_slice %10 {offsets = [0, 0], sizes = [8, 192], strides = [1, 1]} : vector<64x192xf32> to vector<8x192xf32>
    %c0_11 = arith.constant 0 : index
    %c0_12 = arith.constant 0 : index
    %13 = vector.load %arg3[%c0_11, %c0_12] : memref<72x64xf32, #tpu.memory_space<vmem>>, vector<8x64xf32>
    %14 = vector.extract_strided_slice %12 {offsets = [0, 0], sizes = [8, 128], strides = [1, 1]} : vector<8x192xf32> to vector<8x128xf32>
    %15 = arith.negf %14 : vector<8x128xf32>
    %16 = math.exp %15 : vector<8x128xf32>
    %cst_13 = arith.constant 1.000000e+00 : f32
    %17 = vector.broadcast %cst_13 : f32 to vector<8x128xf32>
    %18 = arith.addf %17, %16 : vector<8x128xf32>
    %19 = arith.divf %17, %18 : vector<8x128xf32>
    %20 = vector.extract_strided_slice %19 {offsets = [0, 0], sizes = [8, 64], strides = [1, 1]} : vector<8x128xf32> to vector<8x64xf32>
    %21 = vector.extract_strided_slice %19 {offsets = [0, 64], sizes = [8, 64], strides = [1, 1]} : vector<8x128xf32> to vector<8x64xf32>
    %22 = vector.extract_strided_slice %12 {offsets = [0, 128], sizes = [8, 64], strides = [1, 1]} : vector<8x192xf32> to vector<8x64xf32>
    %23 = vector.broadcast %6 : vector<1x64xf32> to vector<8x64xf32>
    %24 = arith.mulf %20, %23 : vector<8x64xf32>
    %25 = arith.addf %22, %24 : vector<8x64xf32>
    %26 = math.tanh %25 : vector<8x64xf32>
    %27 = arith.subf %11, %26 : vector<8x64xf32>
    %28 = arith.mulf %21, %27 : vector<8x64xf32>
    %29 = arith.addf %26, %28 : vector<8x64xf32>
    %30 = arith.mulf %29, %13 : vector<8x64xf32>
    %31 = arith.subf %29, %11 : vector<8x64xf32>
    %32 = arith.mulf %13, %31 : vector<8x64xf32>
    %33 = arith.addf %11, %32 : vector<8x64xf32>
    %34 = vector.extract_strided_slice %10 {offsets = [8, 0], sizes = [8, 192], strides = [1, 1]} : vector<64x192xf32> to vector<8x192xf32>
    %c8 = arith.constant 8 : index
    %c0_14 = arith.constant 0 : index
    %35 = vector.load %arg3[%c8, %c0_14] : memref<72x64xf32, #tpu.memory_space<vmem>>, vector<8x64xf32>
    %cst_15 = arith.constant dense<0.000000e+00> : vector<8x192xf32>
    %36 = tpu.matmul %33, %1, %cst_15 {dimension_numbers = #tpu.dot_dimension_numbers<[1], [0], [0], [1], [0, 0, 1, 1], [], []>} : vector<8x64xf32>, vector<64x192xf32>, vector<8x192xf32> -> vector<8x192xf32>
    %37 = vector.extract_strided_slice %34 {offsets = [0, 0], sizes = [8, 128], strides = [1, 1]} : vector<8x192xf32> to vector<8x128xf32>
    %38 = vector.extract_strided_slice %36 {offsets = [0, 0], sizes = [8, 128], strides = [1, 1]} : vector<8x192xf32> to vector<8x128xf32>
    %39 = arith.addf %37, %38 : vector<8x128xf32>
    %40 = vector.extract_strided_slice %36 {offsets = [0, 128], sizes = [8, 64], strides = [1, 1]} : vector<8x192xf32> to vector<8x64xf32>
    %41 = vector.broadcast %6 : vector<1x64xf32> to vector<8x64xf32>
    %42 = arith.addf %40, %41 : vector<8x64xf32>
    %43 = arith.negf %39 : vector<8x128xf32>
    %44 = math.exp %43 : vector<8x128xf32>
    %cst_16 = arith.constant 1.000000e+00 : f32
    %45 = vector.broadcast %cst_16 : f32 to vector<8x128xf32>
    %46 = arith.addf %45, %44 : vector<8x128xf32>
    %47 = arith.divf %45, %46 : vector<8x128xf32>
    %48 = vector.extract_strided_slice %47 {offsets = [0, 0], sizes = [8, 64], strides = [1, 1]} : vector<8x128xf32> to vector<8x64xf32>
    %49 = vector.extract_strided_slice %47 {offsets = [0, 64], sizes = [8, 64], strides = [1, 1]} : vector<8x128xf32> to vector<8x64xf32>
    %50 = vector.extract_strided_slice %34 {offsets = [0, 128], sizes = [8, 64], strides = [1, 1]} : vector<8x192xf32> to vector<8x64xf32>
    %51 = arith.mulf %48, %42 : vector<8x64xf32>
    %52 = arith.addf %50, %51 : vector<8x64xf32>
    %53 = math.tanh %52 : vector<8x64xf32>
    %54 = arith.subf %33, %53 : vector<8x64xf32>
    %55 = arith.mulf %49, %54 : vector<8x64xf32>
    %56 = arith.addf %53, %55 : vector<8x64xf32>
    %57 = arith.mulf %56, %35 : vector<8x64xf32>
    %58 = arith.subf %56, %33 : vector<8x64xf32>
    %59 = arith.mulf %35, %58 : vector<8x64xf32>
    %60 = arith.addf %33, %59 : vector<8x64xf32>
    %61 = vector.extract_strided_slice %10 {offsets = [16, 0], sizes = [8, 192], strides = [1, 1]} : vector<64x192xf32> to vector<8x192xf32>
    %c16 = arith.constant 16 : index
    %c0_17 = arith.constant 0 : index
    %62 = vector.load %arg3[%c16, %c0_17] : memref<72x64xf32, #tpu.memory_space<vmem>>, vector<8x64xf32>
    %cst_18 = arith.constant dense<0.000000e+00> : vector<8x192xf32>
    %63 = tpu.matmul %60, %1, %cst_18 {dimension_numbers = #tpu.dot_dimension_numbers<[1], [0], [0], [1], [0, 0, 1, 1], [], []>} : vector<8x64xf32>, vector<64x192xf32>, vector<8x192xf32> -> vector<8x192xf32>
    %64 = vector.extract_strided_slice %61 {offsets = [0, 0], sizes = [8, 128], strides = [1, 1]} : vector<8x192xf32> to vector<8x128xf32>
    %65 = vector.extract_strided_slice %63 {offsets = [0, 0], sizes = [8, 128], strides = [1, 1]} : vector<8x192xf32> to vector<8x128xf32>
    %66 = arith.addf %64, %65 : vector<8x128xf32>
    %67 = vector.extract_strided_slice %63 {offsets = [0, 128], sizes = [8, 64], strides = [1, 1]} : vector<8x192xf32> to vector<8x64xf32>
    %68 = vector.broadcast %6 : vector<1x64xf32> to vector<8x64xf32>
    %69 = arith.addf %67, %68 : vector<8x64xf32>
    %70 = arith.negf %66 : vector<8x128xf32>
    %71 = math.exp %70 : vector<8x128xf32>
    %cst_19 = arith.constant 1.000000e+00 : f32
    %72 = vector.broadcast %cst_19 : f32 to vector<8x128xf32>
    %73 = arith.addf %72, %71 : vector<8x128xf32>
    %74 = arith.divf %72, %73 : vector<8x128xf32>
    %75 = vector.extract_strided_slice %74 {offsets = [0, 0], sizes = [8, 64], strides = [1, 1]} : vector<8x128xf32> to vector<8x64xf32>
    %76 = vector.extract_strided_slice %74 {offsets = [0, 64], sizes = [8, 64], strides = [1, 1]} : vector<8x128xf32> to vector<8x64xf32>
    %77 = vector.extract_strided_slice %61 {offsets = [0, 128], sizes = [8, 64], strides = [1, 1]} : vector<8x192xf32> to vector<8x64xf32>
    %78 = arith.mulf %75, %69 : vector<8x64xf32>
    %79 = arith.addf %77, %78 : vector<8x64xf32>
    %80 = math.tanh %79 : vector<8x64xf32>
    %81 = arith.subf %60, %80 : vector<8x64xf32>
    %82 = arith.mulf %76, %81 : vector<8x64xf32>
    %83 = arith.addf %80, %82 : vector<8x64xf32>
    %84 = arith.mulf %83, %62 : vector<8x64xf32>
    %85 = arith.subf %83, %60 : vector<8x64xf32>
    %86 = arith.mulf %62, %85 : vector<8x64xf32>
    %87 = arith.addf %60, %86 : vector<8x64xf32>
    %88 = vector.extract_strided_slice %10 {offsets = [24, 0], sizes = [8, 192], strides = [1, 1]} : vector<64x192xf32> to vector<8x192xf32>
    %c24 = arith.constant 24 : index
    %c0_20 = arith.constant 0 : index
    %89 = vector.load %arg3[%c24, %c0_20] : memref<72x64xf32, #tpu.memory_space<vmem>>, vector<8x64xf32>
    %cst_21 = arith.constant dense<0.000000e+00> : vector<8x192xf32>
    %90 = tpu.matmul %87, %1, %cst_21 {dimension_numbers = #tpu.dot_dimension_numbers<[1], [0], [0], [1], [0, 0, 1, 1], [], []>} : vector<8x64xf32>, vector<64x192xf32>, vector<8x192xf32> -> vector<8x192xf32>
    %91 = vector.extract_strided_slice %88 {offsets = [0, 0], sizes = [8, 128], strides = [1, 1]} : vector<8x192xf32> to vector<8x128xf32>
    %92 = vector.extract_strided_slice %90 {offsets = [0, 0], sizes = [8, 128], strides = [1, 1]} : vector<8x192xf32> to vector<8x128xf32>
    %93 = arith.addf %91, %92 : vector<8x128xf32>
    %94 = vector.extract_strided_slice %90 {offsets = [0, 128], sizes = [8, 64], strides = [1, 1]} : vector<8x192xf32> to vector<8x64xf32>
    %95 = vector.broadcast %6 : vector<1x64xf32> to vector<8x64xf32>
    %96 = arith.addf %94, %95 : vector<8x64xf32>
    %97 = arith.negf %93 : vector<8x128xf32>
    %98 = math.exp %97 : vector<8x128xf32>
    %cst_22 = arith.constant 1.000000e+00 : f32
    %99 = vector.broadcast %cst_22 : f32 to vector<8x128xf32>
    %100 = arith.addf %99, %98 : vector<8x128xf32>
    %101 = arith.divf %99, %100 : vector<8x128xf32>
    %102 = vector.extract_strided_slice %101 {offsets = [0, 0], sizes = [8, 64], strides = [1, 1]} : vector<8x128xf32> to vector<8x64xf32>
    %103 = vector.extract_strided_slice %101 {offsets = [0, 64], sizes = [8, 64], strides = [1, 1]} : vector<8x128xf32> to vector<8x64xf32>
    %104 = vector.extract_strided_slice %88 {offsets = [0, 128], sizes = [8, 64], strides = [1, 1]} : vector<8x192xf32> to vector<8x64xf32>
    %105 = arith.mulf %102, %96 : vector<8x64xf32>
    %106 = arith.addf %104, %105 : vector<8x64xf32>
    %107 = math.tanh %106 : vector<8x64xf32>
    %108 = arith.subf %87, %107 : vector<8x64xf32>
    %109 = arith.mulf %103, %108 : vector<8x64xf32>
    %110 = arith.addf %107, %109 : vector<8x64xf32>
    %111 = arith.mulf %110, %89 : vector<8x64xf32>
    %112 = arith.subf %110, %87 : vector<8x64xf32>
    %113 = arith.mulf %89, %112 : vector<8x64xf32>
    %114 = arith.addf %87, %113 : vector<8x64xf32>
    %115 = vector.extract_strided_slice %10 {offsets = [32, 0], sizes = [8, 192], strides = [1, 1]} : vector<64x192xf32> to vector<8x192xf32>
    %c32_23 = arith.constant 32 : index
    %c0_24 = arith.constant 0 : index
    %116 = vector.load %arg3[%c32_23, %c0_24] : memref<72x64xf32, #tpu.memory_space<vmem>>, vector<8x64xf32>
    %cst_25 = arith.constant dense<0.000000e+00> : vector<8x192xf32>
    %117 = tpu.matmul %114, %1, %cst_25 {dimension_numbers = #tpu.dot_dimension_numbers<[1], [0], [0], [1], [0, 0, 1, 1], [], []>} : vector<8x64xf32>, vector<64x192xf32>, vector<8x192xf32> -> vector<8x192xf32>
    %118 = vector.extract_strided_slice %115 {offsets = [0, 0], sizes = [8, 128], strides = [1, 1]} : vector<8x192xf32> to vector<8x128xf32>
    %119 = vector.extract_strided_slice %117 {offsets = [0, 0], sizes = [8, 128], strides = [1, 1]} : vector<8x192xf32> to vector<8x128xf32>
    %120 = arith.addf %118, %119 : vector<8x128xf32>
    %121 = vector.extract_strided_slice %117 {offsets = [0, 128], sizes = [8, 64], strides = [1, 1]} : vector<8x192xf32> to vector<8x64xf32>
    %122 = vector.broadcast %6 : vector<1x64xf32> to vector<8x64xf32>
    %123 = arith.addf %121, %122 : vector<8x64xf32>
    %124 = arith.negf %120 : vector<8x128xf32>
    %125 = math.exp %124 : vector<8x128xf32>
    %cst_26 = arith.constant 1.000000e+00 : f32
    %126 = vector.broadcast %cst_26 : f32 to vector<8x128xf32>
    %127 = arith.addf %126, %125 : vector<8x128xf32>
    %128 = arith.divf %126, %127 : vector<8x128xf32>
    %129 = vector.extract_strided_slice %128 {offsets = [0, 0], sizes = [8, 64], strides = [1, 1]} : vector<8x128xf32> to vector<8x64xf32>
    %130 = vector.extract_strided_slice %128 {offsets = [0, 64], sizes = [8, 64], strides = [1, 1]} : vector<8x128xf32> to vector<8x64xf32>
    %131 = vector.extract_strided_slice %115 {offsets = [0, 128], sizes = [8, 64], strides = [1, 1]} : vector<8x192xf32> to vector<8x64xf32>
    %132 = arith.mulf %129, %123 : vector<8x64xf32>
    %133 = arith.addf %131, %132 : vector<8x64xf32>
    %134 = math.tanh %133 : vector<8x64xf32>
    %135 = arith.subf %114, %134 : vector<8x64xf32>
    %136 = arith.mulf %130, %135 : vector<8x64xf32>
    %137 = arith.addf %134, %136 : vector<8x64xf32>
    %138 = arith.mulf %137, %116 : vector<8x64xf32>
    %139 = arith.subf %137, %114 : vector<8x64xf32>
    %140 = arith.mulf %116, %139 : vector<8x64xf32>
    %141 = arith.addf %114, %140 : vector<8x64xf32>
    %142 = vector.extract_strided_slice %10 {offsets = [40, 0], sizes = [8, 192], strides = [1, 1]} : vector<64x192xf32> to vector<8x192xf32>
    %c40 = arith.constant 40 : index
    %c0_27 = arith.constant 0 : index
    %143 = vector.load %arg3[%c40, %c0_27] : memref<72x64xf32, #tpu.memory_space<vmem>>, vector<8x64xf32>
    %cst_28 = arith.constant dense<0.000000e+00> : vector<8x192xf32>
    %144 = tpu.matmul %141, %1, %cst_28 {dimension_numbers = #tpu.dot_dimension_numbers<[1], [0], [0], [1], [0, 0, 1, 1], [], []>} : vector<8x64xf32>, vector<64x192xf32>, vector<8x192xf32> -> vector<8x192xf32>
    %145 = vector.extract_strided_slice %142 {offsets = [0, 0], sizes = [8, 128], strides = [1, 1]} : vector<8x192xf32> to vector<8x128xf32>
    %146 = vector.extract_strided_slice %144 {offsets = [0, 0], sizes = [8, 128], strides = [1, 1]} : vector<8x192xf32> to vector<8x128xf32>
    %147 = arith.addf %145, %146 : vector<8x128xf32>
    %148 = vector.extract_strided_slice %144 {offsets = [0, 128], sizes = [8, 64], strides = [1, 1]} : vector<8x192xf32> to vector<8x64xf32>
    %149 = vector.broadcast %6 : vector<1x64xf32> to vector<8x64xf32>
    %150 = arith.addf %148, %149 : vector<8x64xf32>
    %151 = arith.negf %147 : vector<8x128xf32>
    %152 = math.exp %151 : vector<8x128xf32>
    %cst_29 = arith.constant 1.000000e+00 : f32
    %153 = vector.broadcast %cst_29 : f32 to vector<8x128xf32>
    %154 = arith.addf %153, %152 : vector<8x128xf32>
    %155 = arith.divf %153, %154 : vector<8x128xf32>
    %156 = vector.extract_strided_slice %155 {offsets = [0, 0], sizes = [8, 64], strides = [1, 1]} : vector<8x128xf32> to vector<8x64xf32>
    %157 = vector.extract_strided_slice %155 {offsets = [0, 64], sizes = [8, 64], strides = [1, 1]} : vector<8x128xf32> to vector<8x64xf32>
    %158 = vector.extract_strided_slice %142 {offsets = [0, 128], sizes = [8, 64], strides = [1, 1]} : vector<8x192xf32> to vector<8x64xf32>
    %159 = arith.mulf %156, %150 : vector<8x64xf32>
    %160 = arith.addf %158, %159 : vector<8x64xf32>
    %161 = math.tanh %160 : vector<8x64xf32>
    %162 = arith.subf %141, %161 : vector<8x64xf32>
    %163 = arith.mulf %157, %162 : vector<8x64xf32>
    %164 = arith.addf %161, %163 : vector<8x64xf32>
    %165 = arith.mulf %164, %143 : vector<8x64xf32>
    %166 = arith.subf %164, %141 : vector<8x64xf32>
    %167 = arith.mulf %143, %166 : vector<8x64xf32>
    %168 = arith.addf %141, %167 : vector<8x64xf32>
    %169 = vector.extract_strided_slice %10 {offsets = [48, 0], sizes = [8, 192], strides = [1, 1]} : vector<64x192xf32> to vector<8x192xf32>
    %c48 = arith.constant 48 : index
    %c0_30 = arith.constant 0 : index
    %170 = vector.load %arg3[%c48, %c0_30] : memref<72x64xf32, #tpu.memory_space<vmem>>, vector<8x64xf32>
    %cst_31 = arith.constant dense<0.000000e+00> : vector<8x192xf32>
    %171 = tpu.matmul %168, %1, %cst_31 {dimension_numbers = #tpu.dot_dimension_numbers<[1], [0], [0], [1], [0, 0, 1, 1], [], []>} : vector<8x64xf32>, vector<64x192xf32>, vector<8x192xf32> -> vector<8x192xf32>
    %172 = vector.extract_strided_slice %169 {offsets = [0, 0], sizes = [8, 128], strides = [1, 1]} : vector<8x192xf32> to vector<8x128xf32>
    %173 = vector.extract_strided_slice %171 {offsets = [0, 0], sizes = [8, 128], strides = [1, 1]} : vector<8x192xf32> to vector<8x128xf32>
    %174 = arith.addf %172, %173 : vector<8x128xf32>
    %175 = vector.extract_strided_slice %171 {offsets = [0, 128], sizes = [8, 64], strides = [1, 1]} : vector<8x192xf32> to vector<8x64xf32>
    %176 = vector.broadcast %6 : vector<1x64xf32> to vector<8x64xf32>
    %177 = arith.addf %175, %176 : vector<8x64xf32>
    %178 = arith.negf %174 : vector<8x128xf32>
    %179 = math.exp %178 : vector<8x128xf32>
    %cst_32 = arith.constant 1.000000e+00 : f32
    %180 = vector.broadcast %cst_32 : f32 to vector<8x128xf32>
    %181 = arith.addf %180, %179 : vector<8x128xf32>
    %182 = arith.divf %180, %181 : vector<8x128xf32>
    %183 = vector.extract_strided_slice %182 {offsets = [0, 0], sizes = [8, 64], strides = [1, 1]} : vector<8x128xf32> to vector<8x64xf32>
    %184 = vector.extract_strided_slice %182 {offsets = [0, 64], sizes = [8, 64], strides = [1, 1]} : vector<8x128xf32> to vector<8x64xf32>
    %185 = vector.extract_strided_slice %169 {offsets = [0, 128], sizes = [8, 64], strides = [1, 1]} : vector<8x192xf32> to vector<8x64xf32>
    %186 = arith.mulf %183, %177 : vector<8x64xf32>
    %187 = arith.addf %185, %186 : vector<8x64xf32>
    %188 = math.tanh %187 : vector<8x64xf32>
    %189 = arith.subf %168, %188 : vector<8x64xf32>
    %190 = arith.mulf %184, %189 : vector<8x64xf32>
    %191 = arith.addf %188, %190 : vector<8x64xf32>
    %192 = arith.mulf %191, %170 : vector<8x64xf32>
    %193 = arith.subf %191, %168 : vector<8x64xf32>
    %194 = arith.mulf %170, %193 : vector<8x64xf32>
    %195 = arith.addf %168, %194 : vector<8x64xf32>
    %196 = vector.extract_strided_slice %10 {offsets = [56, 0], sizes = [8, 192], strides = [1, 1]} : vector<64x192xf32> to vector<8x192xf32>
    %c56 = arith.constant 56 : index
    %c0_33 = arith.constant 0 : index
    %197 = vector.load %arg3[%c56, %c0_33] : memref<72x64xf32, #tpu.memory_space<vmem>>, vector<8x64xf32>
    %cst_34 = arith.constant dense<0.000000e+00> : vector<8x192xf32>
    %198 = tpu.matmul %195, %1, %cst_34 {dimension_numbers = #tpu.dot_dimension_numbers<[1], [0], [0], [1], [0, 0, 1, 1], [], []>} : vector<8x64xf32>, vector<64x192xf32>, vector<8x192xf32> -> vector<8x192xf32>
    %199 = vector.extract_strided_slice %196 {offsets = [0, 0], sizes = [8, 128], strides = [1, 1]} : vector<8x192xf32> to vector<8x128xf32>
    %200 = vector.extract_strided_slice %198 {offsets = [0, 0], sizes = [8, 128], strides = [1, 1]} : vector<8x192xf32> to vector<8x128xf32>
    %201 = arith.addf %199, %200 : vector<8x128xf32>
    %202 = vector.extract_strided_slice %198 {offsets = [0, 128], sizes = [8, 64], strides = [1, 1]} : vector<8x192xf32> to vector<8x64xf32>
    %203 = vector.broadcast %6 : vector<1x64xf32> to vector<8x64xf32>
    %204 = arith.addf %202, %203 : vector<8x64xf32>
    %205 = arith.negf %201 : vector<8x128xf32>
    %206 = math.exp %205 : vector<8x128xf32>
    %cst_35 = arith.constant 1.000000e+00 : f32
    %207 = vector.broadcast %cst_35 : f32 to vector<8x128xf32>
    %208 = arith.addf %207, %206 : vector<8x128xf32>
    %209 = arith.divf %207, %208 : vector<8x128xf32>
    %210 = vector.extract_strided_slice %209 {offsets = [0, 0], sizes = [8, 64], strides = [1, 1]} : vector<8x128xf32> to vector<8x64xf32>
    %211 = vector.extract_strided_slice %209 {offsets = [0, 64], sizes = [8, 64], strides = [1, 1]} : vector<8x128xf32> to vector<8x64xf32>
    %212 = vector.extract_strided_slice %196 {offsets = [0, 128], sizes = [8, 64], strides = [1, 1]} : vector<8x192xf32> to vector<8x64xf32>
    %213 = arith.mulf %210, %204 : vector<8x64xf32>
    %214 = arith.addf %212, %213 : vector<8x64xf32>
    %215 = math.tanh %214 : vector<8x64xf32>
    %216 = arith.subf %195, %215 : vector<8x64xf32>
    %217 = arith.mulf %211, %216 : vector<8x64xf32>
    %218 = arith.addf %215, %217 : vector<8x64xf32>
    %219 = arith.mulf %218, %197 : vector<8x64xf32>
    %220 = tpu.concatenate %30, %57, %84, %111, %138, %165, %192, %219 in 0 : vector<8x64xf32>, vector<8x64xf32>, vector<8x64xf32>, vector<8x64xf32>, vector<8x64xf32>, vector<8x64xf32>, vector<8x64xf32>, vector<8x64xf32> -> vector<64x64xf32>
    %221 = tpu.concatenate %219, %192, %165, %138, %111, %84, %57, %30 in 0 : vector<8x64xf32>, vector<8x64xf32>, vector<8x64xf32>, vector<8x64xf32>, vector<8x64xf32>, vector<8x64xf32>, vector<8x64xf32>, vector<8x64xf32> -> vector<64x64xf32>
    %222 = tpu.iota {dimensions = array<i32: 1>} : vector<64x64xi32>
    %c32_i32 = arith.constant 32 : i32
    %223 = vector.broadcast %c32_i32 : i32 to vector<64x64xi32>
    %224 = arith.cmpi slt, %222, %223 : vector<64x64xi32>
    %225 = arith.select %224, %220, %221 : vector<64x64xi1>, vector<64x64xf32>
    %cst_36 = arith.constant dense<0.000000e+00> : vector<64x64xf32>
    %226 = tpu.matmul %225, %3, %cst_36 {dimension_numbers = #tpu.dot_dimension_numbers<[1], [0], [0], [1], [0, 0, 1, 1], [], []>} : vector<64x64xf32>, vector<64x64xf32>, vector<64x64xf32> -> vector<64x64xf32>
    %227 = vector.broadcast %4 : vector<1x64xf32> to vector<64x64xf32>
    %228 = arith.addf %226, %227 : vector<64x64xf32>
    %229 = math.tanh %228 : vector<64x64xf32>
    %230 = vector.broadcast %5 : vector<1x64xf32> to vector<64x64xf32>
    %231 = arith.mulf %229, %230 : vector<64x64xf32>
    %cst_37 = arith.constant dense<0.000000e+00> : vector<64xf32>
    %232 = vector.multi_reduction <add>, %231, %cst_37 [1] : vector<64x64xf32> to vector<64xf32>
    %233 = vector.shape_cast %232 : vector<64xf32> to vector<64x1xf32>
    %234 = vector.extract_strided_slice %233 {offsets = [0, 0], sizes = [8, 1], strides = [1, 1]} : vector<64x1xf32> to vector<8x1xf32>
    %235 = vector.extract_strided_slice %233 {offsets = [8, 0], sizes = [8, 1], strides = [1, 1]} : vector<64x1xf32> to vector<8x1xf32>
    %236 = vector.extract_strided_slice %233 {offsets = [16, 0], sizes = [8, 1], strides = [1, 1]} : vector<64x1xf32> to vector<8x1xf32>
    %237 = vector.extract_strided_slice %233 {offsets = [24, 0], sizes = [8, 1], strides = [1, 1]} : vector<64x1xf32> to vector<8x1xf32>
    %238 = vector.extract_strided_slice %233 {offsets = [32, 0], sizes = [8, 1], strides = [1, 1]} : vector<64x1xf32> to vector<8x1xf32>
    %239 = vector.extract_strided_slice %233 {offsets = [40, 0], sizes = [8, 1], strides = [1, 1]} : vector<64x1xf32> to vector<8x1xf32>
    %240 = vector.extract_strided_slice %233 {offsets = [48, 0], sizes = [8, 1], strides = [1, 1]} : vector<64x1xf32> to vector<8x1xf32>
    %241 = vector.extract_strided_slice %233 {offsets = [56, 0], sizes = [8, 1], strides = [1, 1]} : vector<64x1xf32> to vector<8x1xf32>
    %242 = tpu.concatenate %234, %235, %236, %237, %238, %239, %240, %241 in 1 : vector<8x1xf32>, vector<8x1xf32>, vector<8x1xf32>, vector<8x1xf32>, vector<8x1xf32>, vector<8x1xf32>, vector<8x1xf32>, vector<8x1xf32> -> vector<8x8xf32>
    %c64_38 = arith.constant 64 : index
    %c0_39 = arith.constant 0 : index
    %243 = vector.load %arg3[%c64_38, %c0_39] : memref<72x64xf32, #tpu.memory_space<vmem>>, vector<8x8xf32>
    %244 = arith.addf %242, %243 : vector<8x8xf32>
    %cst_40 = arith.constant dense<0xFF800000> : vector<8xf32>
    %245 = vector.multi_reduction <maximumf>, %244, %cst_40 [1] : vector<8x8xf32> to vector<8xf32>
    %246 = vector.shape_cast %245 : vector<8xf32> to vector<8x1xf32>
    %247 = vector.broadcast %246 : vector<8x1xf32> to vector<8x8xf32>
    %248 = arith.subf %244, %247 : vector<8x8xf32>
    %249 = math.exp %248 : vector<8x8xf32>
    %cst_41 = arith.constant dense<0.000000e+00> : vector<8xf32>
    %250 = vector.multi_reduction <add>, %249, %cst_41 [1] : vector<8x8xf32> to vector<8xf32>
    %251 = vector.shape_cast %250 : vector<8xf32> to vector<8x1xf32>
    %252 = tpu.reciprocal %251 {approx = true} : vector<8x1xf32> -> vector<8x1xf32>
    %253 = vector.broadcast %252 : vector<8x1xf32> to vector<8x8xf32>
    %254 = arith.mulf %249, %253 : vector<8x8xf32>
    %255 = vector.extract_strided_slice %225 {offsets = [0, 0], sizes = [8, 64], strides = [1, 1]} : vector<64x64xf32> to vector<8x64xf32>
    %256 = vector.extract_strided_slice %254 {offsets = [0, 0], sizes = [8, 1], strides = [1, 1]} : vector<8x8xf32> to vector<8x1xf32>
    %257 = vector.broadcast %256 : vector<8x1xf32> to vector<8x64xf32>
    %258 = arith.mulf %255, %257 : vector<8x64xf32>
    %259 = vector.extract_strided_slice %225 {offsets = [8, 0], sizes = [8, 64], strides = [1, 1]} : vector<64x64xf32> to vector<8x64xf32>
    %260 = vector.extract_strided_slice %254 {offsets = [0, 1], sizes = [8, 1], strides = [1, 1]} : vector<8x8xf32> to vector<8x1xf32>
    %261 = vector.broadcast %260 : vector<8x1xf32> to vector<8x64xf32>
    %262 = arith.mulf %259, %261 : vector<8x64xf32>
    %263 = arith.addf %258, %262 : vector<8x64xf32>
    %264 = vector.extract_strided_slice %225 {offsets = [16, 0], sizes = [8, 64], strides = [1, 1]} : vector<64x64xf32> to vector<8x64xf32>
    %265 = vector.extract_strided_slice %254 {offsets = [0, 2], sizes = [8, 1], strides = [1, 1]} : vector<8x8xf32> to vector<8x1xf32>
    %266 = vector.broadcast %265 : vector<8x1xf32> to vector<8x64xf32>
    %267 = arith.mulf %264, %266 : vector<8x64xf32>
    %268 = arith.addf %263, %267 : vector<8x64xf32>
    %269 = vector.extract_strided_slice %225 {offsets = [24, 0], sizes = [8, 64], strides = [1, 1]} : vector<64x64xf32> to vector<8x64xf32>
    %270 = vector.extract_strided_slice %254 {offsets = [0, 3], sizes = [8, 1], strides = [1, 1]} : vector<8x8xf32> to vector<8x1xf32>
    %271 = vector.broadcast %270 : vector<8x1xf32> to vector<8x64xf32>
    %272 = arith.mulf %269, %271 : vector<8x64xf32>
    %273 = arith.addf %268, %272 : vector<8x64xf32>
    %274 = vector.extract_strided_slice %225 {offsets = [32, 0], sizes = [8, 64], strides = [1, 1]} : vector<64x64xf32> to vector<8x64xf32>
    %275 = vector.extract_strided_slice %254 {offsets = [0, 4], sizes = [8, 1], strides = [1, 1]} : vector<8x8xf32> to vector<8x1xf32>
    %276 = vector.broadcast %275 : vector<8x1xf32> to vector<8x64xf32>
    %277 = arith.mulf %274, %276 : vector<8x64xf32>
    %278 = arith.addf %273, %277 : vector<8x64xf32>
    %279 = vector.extract_strided_slice %225 {offsets = [40, 0], sizes = [8, 64], strides = [1, 1]} : vector<64x64xf32> to vector<8x64xf32>
    %280 = vector.extract_strided_slice %254 {offsets = [0, 5], sizes = [8, 1], strides = [1, 1]} : vector<8x8xf32> to vector<8x1xf32>
    %281 = vector.broadcast %280 : vector<8x1xf32> to vector<8x64xf32>
    %282 = arith.mulf %279, %281 : vector<8x64xf32>
    %283 = arith.addf %278, %282 : vector<8x64xf32>
    %284 = vector.extract_strided_slice %225 {offsets = [48, 0], sizes = [8, 64], strides = [1, 1]} : vector<64x64xf32> to vector<8x64xf32>
    %285 = vector.extract_strided_slice %254 {offsets = [0, 6], sizes = [8, 1], strides = [1, 1]} : vector<8x8xf32> to vector<8x1xf32>
    %286 = vector.broadcast %285 : vector<8x1xf32> to vector<8x64xf32>
    %287 = arith.mulf %284, %286 : vector<8x64xf32>
    %288 = arith.addf %283, %287 : vector<8x64xf32>
    %289 = vector.extract_strided_slice %225 {offsets = [56, 0], sizes = [8, 64], strides = [1, 1]} : vector<64x64xf32> to vector<8x64xf32>
    %290 = vector.extract_strided_slice %254 {offsets = [0, 7], sizes = [8, 1], strides = [1, 1]} : vector<8x8xf32> to vector<8x1xf32>
    %291 = vector.broadcast %290 : vector<8x1xf32> to vector<8x64xf32>
    %292 = arith.mulf %289, %291 : vector<8x64xf32>
    %293 = arith.addf %288, %292 : vector<8x64xf32>
    %cst_42 = arith.constant 0.000000e+00 : f32
    %294 = vector.broadcast %cst_42 : f32 to vector<8x56xf32>
    %295 = tpu.concatenate %293, %254, %294 in 1 : vector<8x64xf32>, vector<8x8xf32>, vector<8x56xf32> -> vector<8x128xf32>
    %c0_43 = arith.constant 0 : index
    %c0_44 = arith.constant 0 : index
    %296 = vector.load %arg4[%c0_43, %c0_44] : memref<8x128xf32, #tpu.memory_space<vmem>>, vector<8x128xf32>
    tpu.vector_store %arg4[%c0_43, %c0_44], %295 {strides = array<i32>} : memref<8x128xf32, #tpu.memory_space<vmem>>, vector<8x128xf32>,
    return
  }
}

</mosaic_0001>

<bundles_post_ra>
// kernel: sentence_encoder.1
= control target key start
LH: loop header
LB: loop body
LE: loop exit
PB: predicated region body
PF: predicated region fallthrough
CT: control target
= control target key end

     0   :  { %v1392_v3 = vmov 0.0   ;;  %vm73_vm0 = vcmask 261120   ;;  %v63_v10 = vlaneseq  ;;  %s1393_s15 = smov 64   ;;  %vm239_vm1 = vcmask 523264   ;;  %s1932_s1 = inlined_call_operand.vmem [shape: f32[97,192], index: 1, kind: input, shape index: {}]   ;;  %s1933_s0 = inlined_call_operand.vmem [shape: f32[64,32], index: 0, kind: input, shape index: {}]   ;;  %s1934_s2 = inlined_call_operand.vmem [shape: f32[67,64], index: 2, kind: input, shape index: {}]   ;;  %s1935_s3 = inlined_call_operand.vmem [shape: f32[72,64], index: 3, kind: input, shape index: {}]   ;;  %s1936_s4 = inlined_call_operand.vmem [shape: f32[8,128], index: 4, kind: output, shape index: {}]  }
   0x1   :  { %v24_v0 = vld [vmem:[%s1932_s1 + $0x38] sm:$0xff]  ;;  %v23_v1 = vld [vmem:[%s1932_s1 + $0x30] sm:$0xff]  ;;  %v22_v2 = vld [vmem:[%s1932_s1 + $0x28] sm:$0xff]  ;;  %162 = vmatprep.mubr.f32.mxu0 %v1392_v3  ;;  %186 = vmatprep.mubr.f32.mxu1 %v1392_v3  ;;  %vm1131_vm3 = vcmask 7168   ;;  %vm1133_vm4 = vcmask 15360   ;;  %vm1135_vm5 = vcmask 23552  }
   0x2   :  { %122 = vmatprep.subr.mxu0 %v24_v0  ;;  %v21_v4 = vld [vmem:[%s1932_s1 + $0x20] sm:$0xff]  ;;  %1297 = vmatprep.subr.mxu1 %v24_v0  ;;  %v20_v5 = vld [vmem:[%s1932_s1 + $0x18] sm:$0xff]  ;;  %v19_v6 = vld [vmem:[%s1932_s1 + $0x10] sm:$0xff]  ;;  %v64_v11 = vshrl.u32 %v63_v10, 7  ;;  %vm1137_vm6 = vcmask 31744   ;;  %vm1139_vm7 = vcmask 39936  }
   0x3   :  { %123 = vmatpush1.msra.mxu0 %v23_v1  ;;  %1301 = vmatpush1.msra.mxu1 %v23_v1  ;;  %v18_v7 = vld [vmem:[%s1932_s1 + $0x8] sm:$0xff]  ;;  %v17_v8 = vld [vmem:[%s1932_s1] sm:$0xff]  ;;  %v1477_v28 = vld [vmem:[%s1932_s1 + $0xb8] sm:$0xff]  ;;  %vm1141_vm8 = vcmask 48128   ;;  %vm1143_vm9 = vcmask 56320   ;;  %vm1147_vm10 = vcmask 64512  }
   0x4   :  { %124 = vmatprep.subr.mxu0 %v22_v2  ;;  %1298 = vmatprep.subr.mxu1 %v22_v2  ;;  %v54_v9 = vld [vmem:[%s1933_s0] sm:$0xff]  ;;  %v65_v12 = vsub.s32 0, %v64_v11  ;;  %v69_v20 = vsub.s32 1, %v64_v11  ;;  %v1482_v29 = vld [vmem:[%s1932_s1 + $0xb0] sm:$0xff]  ;;  %v1487_v30 = vld [vmem:[%s1932_s1 + $0xa8] sm:$0xff]  ;;  %vm1211_vm11 = vcmask 588800  }
   0x5   :  { %125 = vmatpush1.msra.mxu0 %v21_v4  ;;  %1302 = vmatpush1.msra.mxu1 %v21_v4  ;;  %v1218_v13 = vld [vmem:[%s1932_s1 + $0xc0] ss:$8 sm:$0x3]  ;;  %v1470_v22 = vld [vmem:[%s1934_s2 + $0x42] ss:$0 sm:$0xff]  ;;  %v1503_v33 = vld [vmem:[%s1932_s1 + $0x98] sm:$0xff] }
   0x6   :  { %126 = vmatprep.subr.mxu0 %v20_v5  ;;  %1299 = vmatprep.subr.mxu1 %v20_v5  ;;  %v1462_v14 = vrot.slane %v1218_v13, %v65_v12  ;;  %v1465_v21 = vrot.slane %v1218_v13, %v69_v20  ;;  %v55_v31 = vld [vmem:[%s1933_s0 + $0x8] sm:$0xff]  ;;  %v1496_v32 = vld [vmem:[%s1932_s1 + $0xa0] sm:$0xff]  ;;  %v1510_v34 = vld [vmem:[%s1932_s1 + $0x90] sm:$0xff] }
   0x7   :  { %127 = vmatpush1.msra.mxu0 %v19_v6  ;;  %1303 = vmatpush1.msra.mxu1 %v19_v6  ;;  %v1517_v35 = vld [vmem:[%s1932_s1 + $0x88] sm:$0xff]  ;;  %v56_v36 = vld [vmem:[%s1933_s0 + $0x10] sm:$0xff]  ;;  %v1526_v37 = vld [vmem:[%s1932_s1 + $0x80] sm:$0xff] }
   0x8   :  { %128 = vmatprep.subr.mxu0 %v18_v7  ;;  %1300 = vmatprep.subr.mxu1 %v18_v7  ;;  %v1532_v38 = vld [vmem:[%s1932_s1 + $0x78] sm:$0xff]  ;;  %v1539_v39 = vld [vmem:[%s1932_s1 + $0x70] sm:$0xff]  ;;  %v1546_v41 = vld [vmem:[%s1932_s1 + $0x68] sm:$0xff] }
   0x9   :  { %129 = vmatpush1.msra.mxu0 %v17_v8  ;;  %1304 = vmatpush1.msra.mxu1 %v17_v8  ;;  %v57_v43 = vld [vmem:[%s1933_s0 + $0x18] sm:$0xff]  ;;  %v1556_v44 = vld [vmem:[%s1932_s1 + $0x60] sm:$0xff]  ;;  %v1572_v46 = vld [vmem:[%s1932_s1 + $0x50] sm:$0xff] }
   0xa   :  { %1219 = vmatmul.mubr.msk.f32.vlgmr.msra.gmra.mxu0 %vm73_vm0, %v54_v9  ;;  %259 = vmatprep.subr.mxu0 %v1477_v28  ;;  %v1563_v45 = vld [vmem:[%s1932_s1 + $0x58] sm:$0xff]  ;;  %v1578_v47 = vld [vmem:[%s1932_s1 + $0x48] sm:$0xff]  ;;  %v1584_v48 = vld [vmem:[%s1932_s1 + $0x40] sm:$0xff] }
   0xb   :  { %168 = vmatprep.mubr.f32.mxu0 %v1392_v3  ;;  %360 = vmatprep.subr.mxu1 %v1477_v28  ;;  %v211_v51 = vld [vmem:[%s1935_s3] sm:$0xff]  ;;  %v59_v12 = vld [vmem:[%s1933_s0 + $0x28] sm:$0xff]  ;;  %v60_v13 = vld [vmem:[%s1933_s0 + $0x30] sm:$0xff] }
   0xc   :  { %260 = vmatpush1.msra.mxu0 %v1482_v29  ;;  %v58_v11 = vld [vmem:[%s1933_s0 + $0x20] sm:$0xff]  ;;  %v238_v20 = vld [vmem:[%s1935_s3 + $0x8] sm:$0xff] }
   0xd   :  { %261 = vmatprep.subr.mxu0 %v1487_v30  ;;  %1223 = vmatmul.mubr.msk.f32.vlgmr.msra.gmra.mxu1 %vm73_vm0, %v58_v11  ;;  %v340_v11 = vld [vmem:[%s1935_s3 + $0x10] sm:$0xff] }
   0xe   :  { %1220 = vmatmul.mubr.msk.f32.gmra.mxu0 %vm73_vm0, %v55_v31  ;;  %361 = vmatpush1.msra.mxu1 %v1482_v29 }
   0xf   :  { %262 = vmatpush1.msra.mxu0 %v1496_v32  ;;  %174 = vmatprep.mubr.f32.mxu0 %v1392_v3 }
  0x10   :  { %263 = vmatprep.subr.mxu0 %v1503_v33  ;;  %192 = vmatprep.mubr.f32.mxu1 %v1392_v3 }
  0x11   :  { %264 = vmatpush1.msra.mxu0 %v1510_v34  ;;  %362 = vmatprep.subr.mxu1 %v1487_v30 }
  0x12   :  { %265 = vmatprep.subr.mxu0 %v1517_v35  ;;  %1221 = vmatmul.mubr.msk.f32.gmra.mxu0 %vm73_vm0, %v56_v36 }
  0x13   :  { %266 = vmatpush1.msra.mxu0 %v1526_v37  ;;  %180 = vmatprep.mubr.f32.mxu0 %v1392_v3 }
  0x14   :  { %267 = vmatprep.subr.mxu0 %v1532_v38  ;;  %363 = vmatpush1.msra.mxu1 %v1496_v32 }
  0x15   :  { %268 = vmatpush1.msra.mxu0 %v1539_v39  ;;  %1224 = vmatmul.mubr.msk.f32.gmra.mxu1 %vm73_vm0, %v59_v12 }
  0x16   :  { %269 = vmatprep.subr.mxu0 %v1546_v41  ;;  %1222 = vmatmul.mubr.msk.f32.gmra.mxu0 %vm73_vm0, %v57_v43 }
  0x17   :  { %270 = vmatpush1.msra.mxu0 %v1556_v44  ;;  %307 = vmatprep.mubr.f32.mxu0 %v1392_v3 }
  0x18   :  { %271 = vmatprep.subr.mxu0 %v1563_v45  ;;  %364 = vmatprep.subr.mxu1 %v1503_v33 }
  0x19   :  { %272 = vmatpush1.msra.mxu0 %v1572_v46  ;;  %365 = vmatpush1.msra.mxu1 %v1510_v34 }
  0x1a   :  { %273 = vmatprep.subr.mxu0 %v1578_v47  ;;  %198 = vmatprep.mubr.f32.mxu1 %v1392_v3 }
  0x1b   :  { %274 = vmatpush1.msra.mxu0 %v1584_v48  ;;  %366 = vmatprep.subr.mxu1 %v1517_v35 }
  0x1c   :  { %461 = vmatprep.subr.mxu0 %v1477_v28  ;;  %367 = vmatpush1.msra.mxu1 %v1526_v37 }
  0x1d   :  { %1225 = vmatmul.mubr.msk.f32.gmra.mxu1 %vm73_vm0, %v60_v13  ;;  %368 = vmatprep.subr.mxu1 %v1532_v38 }
  0x1e   :  { %369 = vmatpush1.msra.mxu1 %v1539_v39  ;;  %204 = vmatprep.mubr.f32.mxu1 %v1392_v3 }
  0x1f   :  { %370 = vmatprep.subr.mxu1 %v1546_v41 }
  0x20   :  { %371 = vmatpush1.msra.mxu1 %v1556_v44 }
  0x21   :  { %372 = vmatprep.subr.mxu1 %v1563_v45 }
  0x22   :  { %373 = vmatpush1.msra.mxu1 %v1572_v46 }
  0x23   :  { %374 = vmatprep.subr.mxu1 %v1578_v47 }
  0x24   :  { %375 = vmatpush1.msra.mxu1 %v1584_v48 }
  0x25   :  { %562 = vmatprep.subr.mxu1 %v1477_v28 }
  0xca   :  { %v164_v15 = vpop.f32.mrf.mxu0 }
  0xcb   :  { %v165_v16 = vadd.f32 %v164_v15, %v1462_v14 }
  0xcc   :  { %v166_v23 = vpop.f32.mrf.mxu0 }
  0xcd   :  { %v1227_v17 = vmul.f32 -1.442695, %v165_v16  ;;  %v167_v25 = vadd.f32 %v166_v23, %v1465_v21  ;;  %v1688_v36 = vpop.f32.mrf.mxu1 }
  0xce   :  { %v170_v55 = vpop.f32.mrf.mxu0 }
  0xcf   :  { %1324 = vpow2.f32 %v1227_v17  ;;  %v171_v61 = vadd.f32 %v170_v55, %v1462_v14  ;;  %v61_v17 = vld [vmem:[%s1933_s0 + $0x38] sm:$0xff] }
  0xd0   :  { %v172_v56 = vpop.f32.mrf.mxu0  ;;  %1226 = vmatmul.mubr.msk.f32.gmra.mxu1 %vm73_vm0, %v61_v17 }
  0xd1   :  { %v173_v7 = vadd.f32 %v172_v56, %v1465_v21  ;;  %408 = vmatprep.mubr.f32.mxu1 %v1392_v3 }
  0xd2   :  { %v1613_v57 = vpop.f32.mrf.mxu0 }
  0xd4   :  { %v1615_v58 = vpop.f32.mrf.mxu0 }
  0xd6   :  { %v1617_v59 = vpop.f32.mrf.mxu0 }
  0xd8   :  { %v1619_v60 = vpop.f32.mrf.mxu0 }
  0xdc   :  { %v1325_v18 = vpop.eup %1324 }
  0xdd   :  { %v215_v19 = vadd.f32 1.0, %v1325_v18 }
  0xdf   :  { %1326 = vrcp.f32 %v215_v19 }
  0xec   :  { %v1327_v24 = vpop.eup %1326 }
  0xed   :  { %v222_v26 = vmul.f32 %v1327_v24, %v1470_v22 }
  0xef   :  { %v223_v27 = vadd.f32 %v222_v26, %v167_v25 }
  0xf1   :  { %1328 = vtanh.f32 %v223_v27 }
  0xfe   :  { %v1329_v40 = vpop.eup %1328 }
  0xff   :  { %v225_v42 = vsub.f32 0.0, %v1329_v40 }
 0x101   :  { %227 = vrot.lane.b32.xlu0 %v225_v42, %s1393_s15 }
 0x173   :  { %v228_v49 = vpop.permute.xlu0 %227 }
 0x174   :  { %v230_v50 = vmul.f32 %v1327_v24, %v228_v49 }
 0x176   :  { %232 = vrot.lane.b32.xlu0 %v230_v50, %s1393_s15 }
 0x1e8   :  { %v233_v52 = vpop.permute.xlu0 %232 }
 0x1e9   :  { %v235_v53 = vadd.f32 %v1329_v40, %v233_v52  ;;  %v1690_v40 = vpop.f32.mrf.mxu1 }
 0x1eb   :  { %v1592_v54 = vmul.f32 %v235_v53, %v211_v51  ;;  %v1692_v42 = vpop.f32.mrf.mxu1  ;;  %v177_v53 = vadd.f32 %v1613_v57, %v1462_v14 }
 0x1ed   :  { %1229 = vmatmul.mubr.msk.f32.vlgmr.msra.gmra.mxu0 %vm239_vm1, %v1592_v54  ;;  %v1694_v43 = vpop.f32.mrf.mxu1 }
 0x1ee   :  { %462 = vmatpush1.msra.mxu0 %v1482_v29  ;;  %509 = vmatprep.mubr.f32.mxu0 %v1392_v3 }
 0x1ef   :  { %463 = vmatprep.subr.mxu0 %v1487_v30  ;;  %v1696_v49 = vpop.f32.mrf.mxu1 }
 0x1f0   :  { %464 = vmatpush1.msra.mxu0 %v1496_v32 }
 0x1f1   :  { %465 = vmatprep.subr.mxu0 %v1503_v33  ;;  %v1698_v50 = vpop.f32.mrf.mxu1 }
 0x1f2   :  { %466 = vmatpush1.msra.mxu0 %v1510_v34 }
 0x1f3   :  { %467 = vmatprep.subr.mxu0 %v1517_v35  ;;  %v1700_v51 = vpop.f32.mrf.mxu1 }
 0x1f4   :  { %468 = vmatpush1.msra.mxu0 %v1526_v37 }
 0x1f5   :  { %469 = vmatprep.subr.mxu0 %v1532_v38  ;;  %v1702_v52 = vpop.f32.mrf.mxu1 }
 0x1f6   :  { %470 = vmatpush1.msra.mxu0 %v1539_v39 }
 0x1f7   :  { %471 = vmatprep.subr.mxu0 %v1546_v41 }
 0x1f8   :  { %472 = vmatpush1.msra.mxu0 %v1556_v44 }
 0x1f9   :  { %473 = vmatprep.subr.mxu0 %v1563_v45 }
 0x1fa   :  { %474 = vmatpush1.msra.mxu0 %v1572_v46 }
 0x1fb   :  { %475 = vmatprep.subr.mxu0 %v1578_v47 }
 0x1fc   :  { %476 = vmatpush1.msra.mxu0 %v1584_v48 }
 0x1fd   :  { %663 = vmatprep.subr.mxu0 %v1477_v28 }
 0x2ad   :  { %v309_v62 = vpop.f32.mrf.mxu0 }
 0x2ae   :  { %v314_v63 = vadd.f32 %v309_v62, %v171_v61 }
 0x2af   :  { %v311_v4 = vpop.f32.mrf.mxu0 }
 0x2b0   :  { %v1230_v0 = vmul.f32 -1.442695, %v314_v63  ;;  %v315_v5 = vadd.f32 %v1470_v22, %v311_v4  ;;  %v179_v4 = vadd.f32 %v1615_v58, %v1465_v21 }
 0x2b2   :  { %1330 = vpow2.f32 %v1230_v0 }
 0x2bf   :  { %v1331_v1 = vpop.eup %1330 }
 0x2c0   :  { %v319_v2 = vadd.f32 1.0, %v1331_v1 }
 0x2c2   :  { %1332 = vrcp.f32 %v319_v2 }
 0x2cf   :  { %v1333_v6 = vpop.eup %1332 }
 0x2d0   :  { %v322_v8 = vmul.f32 %v1333_v6, %v315_v5 }
 0x2d2   :  { %v323_v9 = vadd.f32 %v322_v8, %v173_v7 }
 0x2d4   :  { %1334 = vtanh.f32 %v323_v9 }
 0x2e1   :  { %v1335_v15 = vpop.eup %1334 }
 0x2e2   :  { %v325_v16 = vsub.f32 %v1592_v54, %v1335_v15 }
 0x2e4   :  { %327 = vrot.lane.b32.xlu1 %v325_v16, %s1393_s15 }
 0x356   :  { %v328_v18 = vpop.permute.xlu1 %327 }
 0x357   :  { %v330_v19 = vmul.f32 %v1333_v6, %v328_v18  ;;  %v183_v18 = vadd.f32 %v1617_v59, %v1462_v14 }
 0x359   :  { %332 = vrot.lane.b32.xlu1 %v330_v19, %s1393_s15 }
 0x3cb   :  { %v333_v23 = vpop.permute.xlu1 %332 }
 0x3cc   :  { %v335_v24 = vadd.f32 %v1335_v15, %v333_v23 }
 0x3ce   :  { %v1666_v25 = vmul.f32 %v335_v24, %v238_v20  ;;  %v337_v26 = vsub.f32 %v335_v24, %v1592_v54 }
 0x3d0   :  { %v338_v27 = vmul.f32 %v337_v26, %v238_v20 }
 0x3d2   :  { %v339_v31 = vadd.f32 %v338_v27, %v1592_v54 }
 0x3d4   :  { %1231 = vmatmul.mubr.msk.f32.vlgmr.msra.gmra.mxu1 %vm239_vm1, %v339_v31 }
 0x3d5   :  { %563 = vmatpush1.msra.mxu1 %v1482_v29  ;;  %610 = vmatprep.mubr.f32.mxu1 %v1392_v3 }
 0x3d6   :  { %564 = vmatprep.subr.mxu1 %v1487_v30 }
 0x3d7   :  { %565 = vmatpush1.msra.mxu1 %v1496_v32 }
 0x3d8   :  { %566 = vmatprep.subr.mxu1 %v1503_v33 }
 0x3d9   :  { %567 = vmatpush1.msra.mxu1 %v1510_v34 }
 0x3da   :  { %568 = vmatprep.subr.mxu1 %v1517_v35 }
 0x3db   :  { %569 = vmatpush1.msra.mxu1 %v1526_v37 }
 0x3dc   :  { %570 = vmatprep.subr.mxu1 %v1532_v38 }
 0x3dd   :  { %571 = vmatpush1.msra.mxu1 %v1539_v39 }
 0x3de   :  { %572 = vmatprep.subr.mxu1 %v1546_v41 }
 0x3df   :  { %573 = vmatpush1.msra.mxu1 %v1556_v44 }
 0x3e0   :  { %574 = vmatprep.subr.mxu1 %v1563_v45 }
 0x3e1   :  { %575 = vmatpush1.msra.mxu1 %v1572_v46 }
 0x3e2   :  { %576 = vmatprep.subr.mxu1 %v1578_v47 }
 0x3e3   :  { %577 = vmatpush1.msra.mxu1 %v1584_v48 }
 0x3e4   :  { %764 = vmatprep.subr.mxu1 %v1477_v28 }
 0x494   :  { %v410_v55 = vpop.f32.mrf.mxu1 }
 0x495   :  { %v415_v56 = vadd.f32 %v410_v55, %v177_v53  ;;  %v185_v55 = vadd.f32 %v1619_v60, %v1465_v21 }
 0x496   :  { %v412_v0 = vpop.f32.mrf.mxu1 }
 0x497   :  { %v1232_v61 = vmul.f32 -1.442695, %v415_v56  ;;  %v416_v1 = vadd.f32 %v1470_v22, %v412_v0  ;;  %v441_v0 = vld [vmem:[%s1935_s3 + $0x18] sm:$0xff] }
 0x499   :  { %1336 = vpow2.f32 %v1232_v61 }
 0x4a6   :  { %v1337_v62 = vpop.eup %1336 }
 0x4a7   :  { %v420_v63 = vadd.f32 1.0, %v1337_v62 }
 0x4a9   :  { %1338 = vrcp.f32 %v420_v63 }
 0x4b6   :  { %v1339_v2 = vpop.eup %1338 }
 0x4b7   :  { %v423_v5 = vmul.f32 %v1339_v2, %v416_v1 }
 0x4b9   :  { %v424_v6 = vadd.f32 %v423_v5, %v179_v4 }
 0x4bb   :  { %1340 = vtanh.f32 %v424_v6 }
 0x4c8   :  { %v1341_v7 = vpop.eup %1340 }
 0x4c9   :  { %v426_v8 = vsub.f32 %v339_v31, %v1341_v7 }
 0x4cb   :  { %428 = vrot.lane.b32.xlu0 %v426_v8, %s1393_s15 }
 0x53d   :  { %v429_v57 = vpop.permute.xlu0 %428 }
 0x53e   :  { %v431_v9 = vmul.f32 %v1339_v2, %v429_v57 }
 0x540   :  { %433 = vrot.lane.b32.xlu1 %v431_v9, %s1393_s15 }
 0x5b2   :  { %v434_v12 = vpop.permute.xlu1 %433 }
 0x5b3   :  { %v436_v13 = vadd.f32 %v1341_v7, %v434_v12  ;;  %v189_v7 = vadd.f32 %v1688_v36, %v1462_v14 }
 0x5b5   :  { %v1714_v15 = vmul.f32 %v436_v13, %v340_v11  ;;  %v438_v58 = vsub.f32 %v436_v13, %v339_v31 }
 0x5b7   :  { %v439_v16 = vmul.f32 %v438_v58, %v340_v11 }
 0x5b9   :  { %v440_v17 = vadd.f32 %v439_v16, %v339_v31 }
 0x5bb   :  { %1233 = vmatmul.mubr.msk.f32.vlgmr.msra.gmra.mxu0 %vm239_vm1, %v440_v17 }
 0x5bc   :  { %664 = vmatpush1.msra.mxu0 %v1482_v29  ;;  %711 = vmatprep.mubr.f32.mxu0 %v1392_v3 }
 0x5bd   :  { %665 = vmatprep.subr.mxu0 %v1487_v30 }
 0x5be   :  { %666 = vmatpush1.msra.mxu0 %v1496_v32 }
 0x5bf   :  { %667 = vmatprep.subr.mxu0 %v1503_v33 }
 0x5c0   :  { %668 = vmatpush1.msra.mxu0 %v1510_v34 }
 0x5c1   :  { %669 = vmatprep.subr.mxu0 %v1517_v35 }
 0x5c2   :  { %670 = vmatpush1.msra.mxu0 %v1526_v37 }
 0x5c3   :  { %671 = vmatprep.subr.mxu0 %v1532_v38 }
 0x5c4   :  { %672 = vmatpush1.msra.mxu0 %v1539_v39 }
 0x5c5   :  { %673 = vmatprep.subr.mxu0 %v1546_v41 }
 0x5c6   :  { %674 = vmatpush1.msra.mxu0 %v1556_v44 }
 0x5c7   :  { %675 = vmatprep.subr.mxu0 %v1563_v45 }
 0x5c8   :  { %676 = vmatpush1.msra.mxu0 %v1572_v46 }
 0x5c9   :  { %677 = vmatprep.subr.mxu0 %v1578_v47 }
 0x5ca   :  { %678 = vmatpush1.msra.mxu0 %v1584_v48 }
 0x5cb   :  { %865 = vmatprep.subr.mxu0 %v1477_v28 }
 0x67b   :  { %v511_v19 = vpop.f32.mrf.mxu0 }
 0x67c   :  { %v516_v20 = vadd.f32 %v511_v19, %v183_v18 }
 0x67d   :  { %v513_v27 = vpop.f32.mrf.mxu0 }
 0x67e   :  { %v1234_v23 = vmul.f32 -1.442695, %v516_v20  ;;  %v517_v31 = vadd.f32 %v1470_v22, %v513_v27  ;;  %v542_v27 = vld [vmem:[%s1935_s3 + $0x20] sm:$0xff] }
 0x680   :  { %1342 = vpow2.f32 %v1234_v23 }
 0x68d   :  { %v1343_v24 = vpop.eup %1342 }
 0x68e   :  { %v521_v26 = vadd.f32 1.0, %v1343_v24 }
 0x690   :  { %1344 = vrcp.f32 %v521_v26  ;;  %v1769_v26 = vand.u32 127, %v63_v10 }
 0x692   :  { %vm945_vm2 = vcmp.lt.s32.totalorder %v1769_v26, 32 }
 0x69d   :  { %v1345_v53 = vpop.eup %1344 }
 0x69e   :  { %v524_v56 = vmul.f32 %v1345_v53, %v517_v31 }
 0x6a0   :  { %v525_v61 = vadd.f32 %v524_v56, %v185_v55 }
 0x6a2   :  { %1346 = vtanh.f32 %v525_v61 }
 0x6af   :  { %v1347_v28 = vpop.eup %1346 }
 0x6b0   :  { %v527_v62 = vsub.f32 %v440_v17, %v1347_v28 }
 0x6b2   :  { %529 = vrot.lane.b32.xlu0 %v527_v62, %s1393_s15 }
 0x724   :  { %v530_v59 = vpop.permute.xlu0 %529 }
 0x725   :  { %v532_v63 = vmul.f32 %v1345_v53, %v530_v59 }
 0x727   :  { %534 = vrot.lane.b32.xlu1 %v532_v63, %s1393_s15 }
 0x799   :  { %v535_v1 = vpop.permute.xlu1 %534 }
 0x79a   :  { %v537_v2 = vadd.f32 %v1347_v28, %v535_v1 }
 0x79c   :  { %v538_v4 = vmul.f32 %v537_v2, %v441_v0  ;;  %v539_v5 = vsub.f32 %v537_v2, %v440_v17 }
 0x79e   :  { %v540_v60 = vmul.f32 %v539_v5, %v441_v0  ;;  %v201_v5 = vadd.f32 %v1696_v49, %v1462_v14 }
 0x7a0   :  { %v541_v6 = vadd.f32 %v540_v60, %v440_v17  ;;  %v191_v17 = vadd.f32 %v1690_v40, %v1465_v21 }
 0x7a2   :  { %1235 = vmatmul.mubr.msk.f32.vlgmr.msra.gmra.mxu1 %vm239_vm1, %v541_v6 }
 0x7a3   :  { %765 = vmatpush1.msra.mxu1 %v1482_v29  ;;  %812 = vmatprep.mubr.f32.mxu1 %v1392_v3 }
 0x7a4   :  { %766 = vmatprep.subr.mxu1 %v1487_v30 }
 0x7a5   :  { %767 = vmatpush1.msra.mxu1 %v1496_v32 }
 0x7a6   :  { %768 = vmatprep.subr.mxu1 %v1503_v33 }
 0x7a7   :  { %769 = vmatpush1.msra.mxu1 %v1510_v34 }
 0x7a8   :  { %770 = vmatprep.subr.mxu1 %v1517_v35 }
 0x7a9   :  { %771 = vmatpush1.msra.mxu1 %v1526_v37 }
 0x7aa   :  { %772 = vmatprep.subr.mxu1 %v1532_v38 }
 0x7ab   :  { %773 = vmatpush1.msra.mxu1 %v1539_v39 }
 0x7ac   :  { %774 = vmatprep.subr.mxu1 %v1546_v41 }
 0x7ad   :  { %775 = vmatpush1.msra.mxu1 %v1556_v44 }
 0x7ae   :  { %776 = vmatprep.subr.mxu1 %v1563_v45 }
 0x7af   :  { %777 = vmatpush1.msra.mxu1 %v1572_v46 }
 0x7b0   :  { %778 = vmatprep.subr.mxu1 %v1578_v47 }
 0x7b1   :  { %779 = vmatpush1.msra.mxu1 %v1584_v48 }
 0x862   :  { %v612_v8 = vpop.f32.mrf.mxu1 }
 0x863   :  { %v617_v57 = vadd.f32 %v612_v8, %v189_v7 }
 0x864   :  { %v614_v13 = vpop.f32.mrf.mxu1 }
 0x865   :  { %v1236_v9 = vmul.f32 -1.442695, %v617_v57  ;;  %v618_v58 = vadd.f32 %v1470_v22, %v614_v13 }
 0x867   :  { %1348 = vpow2.f32 %v1236_v9 }
 0x874   :  { %v1349_v11 = vpop.eup %1348 }
 0x875   :  { %v622_v12 = vadd.f32 1.0, %v1349_v11 }
 0x877   :  { %1350 = vrcp.f32 %v622_v12 }
 0x884   :  { %v1351_v16 = vpop.eup %1350 }
 0x885   :  { %v625_v18 = vmul.f32 %v1351_v16, %v618_v58 }
 0x887   :  { %v626_v19 = vadd.f32 %v625_v18, %v191_v17 }
 0x889   :  { %1352 = vtanh.f32 %v626_v19  ;;  %v744_v19 = vld [vmem:[%s1935_s3 + $0x30] sm:$0xff] }
 0x896   :  { %v1353_v20 = vpop.eup %1352 }
 0x897   :  { %v628_v23 = vsub.f32 %v541_v6, %v1353_v20 }
 0x899   :  { %630 = vrot.lane.b32.xlu0 %v628_v23, %s1393_s15 }
 0x90b   :  { %v631_v36 = vpop.permute.xlu0 %630 }
 0x90c   :  { %v633_v24 = vmul.f32 %v1351_v16, %v631_v36 }
 0x90e   :  { %635 = vrot.lane.b32.xlu1 %v633_v24, %s1393_s15 }
 0x980   :  { %v636_v31 = vpop.permute.xlu1 %635 }
 0x981   :  { %v638_v40 = vadd.f32 %v1353_v20, %v636_v31 }
 0x983   :  { %v639_v53 = vmul.f32 %v638_v40, %v542_v27  ;;  %v640_v55 = vsub.f32 %v638_v40, %v541_v6 }
 0x985   :  { %v641_v56 = vmul.f32 %v640_v55, %v542_v27  ;;  %v1777_v61 = vsel %vm945_vm2, %v538_v4, %v639_v53  ;;  %v1781_v28 = vsel %vm945_vm2, %v639_v53, %v538_v4  ;;  %v207_v53 = vadd.f32 %v1700_v51, %v1462_v14  ;;  %v49_v51 = vld [vmem:[%s1934_s2 + $0x30] sm:$0xff] }
 0x987   :  { %v642_v10 = vadd.f32 %v641_v56, %v541_v6 }
 0x989   :  { %1237 = vmatmul.mubr.msk.f32.vlgmr.msra.gmra.mxu0 %vm239_vm1, %v642_v10 }
 0x98a   :  { %866 = vmatpush1.msra.mxu0 %v1482_v29  ;;  %913 = vmatprep.mubr.f32.mxu0 %v1392_v3  ;;  %v195_v3 = vadd.f32 %v1692_v42, %v1462_v14  ;;  %v643_v42 = vld [vmem:[%s1935_s3 + $0x28] sm:$0xff]  ;;  %v50_v14 = vld [vmem:[%s1934_s2 + $0x38] sm:$0xff] }
 0x98b   :  { %867 = vmatprep.subr.mxu0 %v1487_v30  ;;  %1269 = vmatprep.subr.mxu1 %v50_v14 }
 0x98c   :  { %868 = vmatpush1.msra.mxu0 %v1496_v32 }
 0x98d   :  { %869 = vmatprep.subr.mxu0 %v1503_v33 }
 0x98e   :  { %870 = vmatpush1.msra.mxu0 %v1510_v34 }
 0x98f   :  { %871 = vmatprep.subr.mxu0 %v1517_v35 }
 0x990   :  { %872 = vmatpush1.msra.mxu0 %v1526_v37 }
 0x991   :  { %873 = vmatprep.subr.mxu0 %v1532_v38 }
 0x992   :  { %874 = vmatpush1.msra.mxu0 %v1539_v39  ;;  %v197_v39 = vadd.f32 %v1694_v43, %v1465_v21 }
 0x993   :  { %875 = vmatprep.subr.mxu0 %v1546_v41 }
 0x994   :  { %876 = vmatpush1.msra.mxu0 %v1556_v44 }
 0x995   :  { %877 = vmatprep.subr.mxu0 %v1563_v45 }
 0x996   :  { %878 = vmatpush1.msra.mxu0 %v1572_v46 }
 0x997   :  { %879 = vmatprep.subr.mxu0 %v1578_v47 }
 0x998   :  { %880 = vmatpush1.msra.mxu0 %v1584_v48 }
 0xa49   :  { %v713_v29 = vpop.f32.mrf.mxu0 }
 0xa4a   :  { %v718_v30 = vadd.f32 %v713_v29, %v195_v3 }
 0xa4b   :  { %v715_v35 = vpop.f32.mrf.mxu0 }
 0xa4c   :  { %v1238_v32 = vmul.f32 -1.442695, %v718_v30  ;;  %v719_v37 = vadd.f32 %v1470_v22, %v715_v35 }
 0xa4e   :  { %1354 = vpow2.f32 %v1238_v32 }
 0xa5b   :  { %v1355_v33 = vpop.eup %1354 }
 0xa5c   :  { %v723_v34 = vadd.f32 1.0, %v1355_v33 }
 0xa5e   :  { %1356 = vrcp.f32 %v723_v34 }
 0xa6b   :  { %v1357_v38 = vpop.eup %1356 }
 0xa6c   :  { %v726_v41 = vmul.f32 %v1357_v38, %v719_v37 }
 0xa6e   :  { %v727_v44 = vadd.f32 %v726_v41, %v197_v39  ;;  %v45_v39 = vld [vmem:[%s1934_s2 + $0x10] sm:$0xff]  ;;  %v44_v41 = vld [vmem:[%s1934_s2 + $0x8] sm:$0xff] }
 0xa70   :  { %1358 = vtanh.f32 %v727_v44  ;;  %v43_v44 = vld [vmem:[%s1934_s2] sm:$0xff] }
 0xa7d   :  { %v1359_v45 = vpop.eup %1358 }
 0xa7e   :  { %v729_v46 = vsub.f32 %v642_v10, %v1359_v45 }
 0xa80   :  { %731 = vrot.lane.b32.xlu0 %v729_v46, %s1393_s15 }
 0xaf2   :  { %v732_v47 = vpop.permute.xlu0 %731 }
 0xaf3   :  { %v734_v48 = vmul.f32 %v1357_v38, %v732_v47  ;;  %v845_v47 = vld [vmem:[%s1935_s3 + $0x38] sm:$0xff] }
 0xaf5   :  { %736 = vrot.lane.b32.xlu1 %v734_v48, %s1393_s15 }
 0xb67   :  { %v737_v62 = vpop.permute.xlu1 %736 }
 0xb68   :  { %v739_v59 = vadd.f32 %v1359_v45, %v737_v62 }
 0xb6a   :  { %v740_v63 = vmul.f32 %v739_v59, %v643_v42  ;;  %v741_v0 = vsub.f32 %v739_v59, %v642_v10 }
 0xb6c   :  { %v742_v43 = vmul.f32 %v741_v0, %v643_v42  ;;  %v1813_v1 = vsel %vm945_vm2, %v1714_v15, %v740_v63  ;;  %v1818_v2 = vsel %vm945_vm2, %v740_v63, %v1714_v15  ;;  %v203_v15 = vadd.f32 %v1698_v50, %v1465_v21  ;;  %v1243_v0 = vld [vmem:[%s1934_s2 + $0x40] ss:$0 sm:$0xff] }
 0xb6e   :  { %v743_v4 = vadd.f32 %v742_v43, %v642_v10 }
 0xb70   :  { %1239 = vmatmul.mubr.msk.f32.vlgmr.msra.gmra.mxu1 %vm239_vm1, %v743_v4 }
 0xb71   :  { %1270 = vmatpush3.msra.mxu1 %v50_v14 }
 0xb72   :  { %1271 = vmatprep.subr.mxu1 %v49_v51 }
 0xb73   :  { %1272 = vmatpush3.msra.mxu1 %v49_v51 }
 0xc30   :  { %v814_v60 = vpop.f32.mrf.mxu1 }
 0xc31   :  { %v819_v6 = vadd.f32 %v814_v60, %v201_v5 }
 0xc32   :  { %v816_v9 = vpop.f32.mrf.mxu1 }
 0xc33   :  { %v1240_v7 = vmul.f32 -1.442695, %v819_v6  ;;  %v820_v11 = vadd.f32 %v1470_v22, %v816_v9 }
 0xc35   :  { %1360 = vpow2.f32 %v1240_v7 }
 0xc42   :  { %v1361_v8 = vpop.eup %1360 }
 0xc43   :  { %v824_v57 = vadd.f32 1.0, %v1361_v8 }
 0xc45   :  { %1362 = vrcp.f32 %v824_v57 }
 0xc52   :  { %v1363_v12 = vpop.eup %1362 }
 0xc53   :  { %v827_v13 = vmul.f32 %v1363_v12, %v820_v11 }
 0xc55   :  { %v828_v58 = vadd.f32 %v827_v13, %v203_v15 }
 0xc57   :  { %1364 = vtanh.f32 %v828_v58  ;;  %v1252_v58 = vld [vmem:[%s1934_s2 + $0x41] ss:$0 sm:$0xff] }
 0xc64   :  { %v1365_v16 = vpop.eup %1364 }
 0xc65   :  { %v830_v17 = vsub.f32 %v743_v4, %v1365_v16 }
 0xc67   :  { %832 = vrot.lane.b32.xlu0 %v830_v17, %s1393_s15 }
 0xcd9   :  { %v833_v49 = vpop.permute.xlu0 %832 }
 0xcda   :  { %v835_v18 = vmul.f32 %v1363_v12, %v833_v49 }
 0xcdc   :  { %837 = vrot.lane.b32.xlu1 %v835_v18, %s1393_s15 }
 0xd4e   :  { %v838_v20 = vpop.permute.xlu1 %837 }
 0xd4f   :  { %v840_v23 = vadd.f32 %v1365_v16, %v838_v20 }
 0xd51   :  { %v841_v36 = vmul.f32 %v840_v23, %v744_v19  ;;  %v842_v24 = vsub.f32 %v840_v23, %v743_v4 }
 0xd53   :  { %v843_v50 = vmul.f32 %v842_v24, %v744_v19  ;;  %v1834_v27 = vsel %vm945_vm2, %v1666_v25, %v841_v36  ;;  %v1839_v31 = vsel %vm945_vm2, %v841_v36, %v1666_v25  ;;  %v209_v25 = vadd.f32 %v1702_v52, %v1465_v21  ;;  %v47_v21 = vld [vmem:[%s1934_s2 + $0x20] sm:$0xff]  ;;  %v46_v52 = vld [vmem:[%s1934_s2 + $0x18] sm:$0xff] }
 0xd55   :  { %v844_v40 = vadd.f32 %v843_v50, %v743_v4 }
 0xd57   :  { %1241 = vmatmul.mubr.msk.f32.vlgmr.msra.gmra.mxu0 %vm239_vm1, %v844_v40 }
 0xe17   :  { %v915_v55 = vpop.f32.mrf.mxu0 }
 0xe18   :  { %v920_v56 = vadd.f32 %v915_v55, %v207_v53 }
 0xe19   :  { %v917_v30 = vpop.f32.mrf.mxu0 }
 0xe1a   :  { %v1242_v10 = vmul.f32 -1.442695, %v920_v56  ;;  %v921_v32 = vadd.f32 %v1470_v22, %v917_v30  ;;  %v48_v22 = vld [vmem:[%s1934_s2 + $0x28] sm:$0xff] }
 0xe1b   :  { %1273 = vmatprep.subr.mxu1 %v48_v22 }
 0xe1c   :  { %1366 = vpow2.f32 %v1242_v10  ;;  %1274 = vmatpush3.msra.mxu1 %v48_v22 }
 0xe1d   :  { %1275 = vmatprep.subr.mxu1 %v47_v21 }
 0xe1e   :  { %1276 = vmatpush3.msra.mxu1 %v47_v21 }
 0xe1f   :  { %1277 = vmatprep.subr.mxu1 %v46_v52 }
 0xe20   :  { %1278 = vmatpush3.msra.mxu1 %v46_v52 }
 0xe21   :  { %1279 = vmatprep.subr.mxu1 %v45_v39 }
 0xe22   :  { %1280 = vmatpush3.msra.mxu1 %v45_v39 }
 0xe23   :  { %1281 = vmatprep.subr.mxu1 %v44_v41 }
 0xe24   :  { %1282 = vmatpush3.msra.mxu1 %v44_v41 }
 0xe25   :  { %1283 = vmatprep.subr.mxu1 %v43_v44 }
 0xe26   :  { %1284 = vmatpush3.msra.mxu1 %v43_v44 }
 0xe29   :  { %v1367_v3 = vpop.eup %1366 }
 0xe2a   :  { %v925_v29 = vadd.f32 1.0, %v1367_v3 }
 0xe2c   :  { %1368 = vrcp.f32 %v925_v29 }
 0xe39   :  { %v1369_v33 = vpop.eup %1368 }
 0xe3a   :  { %v928_v34 = vmul.f32 %v1369_v33, %v921_v32 }
 0xe3c   :  { %v929_v35 = vadd.f32 %v928_v34, %v209_v25 }
 0xe3e   :  { %1370 = vtanh.f32 %v929_v35 }
 0xe4b   :  { %v1371_v37 = vpop.eup %1370 }
 0xe4c   :  { %v931_v38 = vsub.f32 %v844_v40, %v1371_v37 }
 0xe4e   :  { %933 = vrot.lane.b32.xlu0 %v931_v38, %s1393_s15 }
 0xec0   :  { %v934_v45 = vpop.permute.xlu0 %933 }
 0xec1   :  { %v936_v46 = vmul.f32 %v1369_v33, %v934_v45 }
 0xec3   :  { %938 = vrot.lane.b32.xlu1 %v936_v46, %s1393_s15 }
 0xf35   :  { %v939_v48 = vpop.permute.xlu1 %938 }
 0xf36   :  { %v941_v42 = vadd.f32 %v1371_v37, %v939_v48 }
 0xf38   :  { %v942_v62 = vmul.f32 %v941_v42, %v845_v47  ;;  %v1145_v42 = vld [vmem:[%s1935_s3 + $0x40] sm:$0xff] }
 0xf3a   :  { %v1879_v59 = vsel %vm945_vm2, %v1592_v54, %v942_v62  ;;  %v1898_v63 = vsel %vm945_vm2, %v942_v62, %v1592_v54 }
 0xf3b   :  { %1285 = vmatprep.mubr.msk.f32.mxu1 %vm239_vm1, %v1879_v59 }
 0xf3c   :  { %1286 = vmatmul.mubr.msk.f32.vlgmr.msra.gmra.mxu1 %vm239_vm1, %v1834_v27 }
 0xf3d   :  { %1288 = vmatprep.mubr.msk.f32.mxu1 %vm239_vm1, %v1813_v1 }
 0xf40   :  { %1289 = vmatmul.mubr.msk.f32.gmra.mxu1 %vm239_vm1, %v1777_v61 }
 0xf41   :  { %1291 = vmatprep.mubr.msk.f32.mxu1 %vm239_vm1, %v1781_v28 }
 0xf44   :  { %1292 = vmatmul.mubr.msk.f32.gmra.mxu1 %vm239_vm1, %v1818_v2 }
 0xf45   :  { %1294 = vmatprep.mubr.msk.f32.mxu1 %vm239_vm1, %v1839_v31 }
 0xf48   :  { %1295 = vmatmul.mubr.msk.f32.gmra.mxu1 %vm239_vm1, %v1898_v63 }
 0xffc   :  { %v1287_v43 = vpop.f32.mrf.mxu1 }
 0xffd   :  { %v1054_v4 = vadd.f32 %v1287_v43, %v1243_v0 }
 0xffe   :  { %v1048_v5 = vpop.f32.mrf.mxu1 }
 0xfff   :  { %1372 = vtanh.f32 %v1054_v4  ;;  %v1049_v60 = vadd.f32 %v1243_v0, %v1048_v5 }
0x1000   :  { %v1290_v6 = vpop.f32.mrf.mxu1 }
0x1001   :  { %1374 = vtanh.f32 %v1049_v60  ;;  %v1064_v7 = vadd.f32 %v1290_v6, %v1243_v0 }
0x1002   :  { %v1058_v8 = vpop.f32.mrf.mxu1 }
0x1003   :  { %1376 = vtanh.f32 %v1064_v7  ;;  %v1059_v26 = vadd.f32 %v1243_v0, %v1058_v8 }
0x1004   :  { %v1293_v54 = vpop.f32.mrf.mxu1 }
0x1005   :  { %1378 = vtanh.f32 %v1059_v26  ;;  %v1074_v57 = vadd.f32 %v1293_v54, %v1243_v0  ;;  %v1394_v54 = vmov 1  }
0x1006   :  { %v1068_v9 = vpop.f32.mrf.mxu1  ;;  %1316 = vset.pattern.permute.xlu0 %v1394_v54 }
0x1007   :  { %v1069_v11 = vadd.f32 %v1243_v0, %v1068_v9  ;;  %1380 = vtanh.f32 %v1074_v57  ;;  %v1395_v57 = vmov 0  }
0x1008   :  { %v1296_v12 = vpop.f32.mrf.mxu1  ;;  %1315 = vset.pattern.permute.xlu1 %v1395_v57 }
0x1009   :  { %1382 = vtanh.f32 %v1069_v11  ;;  %v1084_v15 = vadd.f32 %v1296_v12, %v1243_v0 }
0x100a   :  { %v1078_v13 = vpop.f32.mrf.mxu1 }
0x100b   :  { %v1079_v16 = vadd.f32 %v1243_v0, %v1078_v13  ;;  %1384 = vtanh.f32 %v1084_v15  ;;  %v1396_v15 = vmov 2   ;;  %v1397_v13 = vmov 7  }
0x100c   :  { %v1373_v17 = vpop.eup %1372 }
0x100d   :  { %1386 = vtanh.f32 %v1079_v16  ;;  %v1100_v49 = vmul.f32 %v1373_v17, %v1252_v58  ;;  %v1399_v16 = vmov 4   ;;  %v1400_v17 = vmov 5  }
0x100e   :  { %v1375_v18 = vpop.eup %1374 }
0x100f   :  { %v1110_v19 = vsel %vm239_vm1, %v1100_v49, 0.0  ;;  %v1099_v20 = vmul.f32 %v1375_v18, %v1252_v58  ;;  %v1401_v49 = vmov 6  }
0x1010   :  { %v1377_v23 = vpop.eup %1376  ;;  %1111 = vadd.xlane.f32.xlu1 %v1110_v19 }
0x1011   :  { %v1107_v36 = vsel %vm239_vm1, %v1099_v20, 0.0  ;;  %v1102_v24 = vmul.f32 %v1377_v23, %v1252_v58 }
0x1012   :  { %v1379_v50 = vpop.eup %1378  ;;  %1108 = vadd.xlane.f32.xlu0 %v1107_v36 }
0x1013   :  { %v1116_v53 = vsel %vm239_vm1, %v1102_v24, 0.0  ;;  %v1101_v55 = vmul.f32 %v1379_v50, %v1252_v58 }
0x1014   :  { %v1381_v40 = vpop.eup %1380 }
0x1015   :  { %v1113_v30 = vsel %vm239_vm1, %v1101_v55, 0.0  ;;  %v1104_v32 = vmul.f32 %v1381_v40, %v1252_v58 }
0x1016   :  { %v1383_v56 = vpop.eup %1382  ;;  %1117 = vadd.xlane.f32.xlu0 %v1116_v53 }
0x1017   :  { %v1103_v10 = vmul.f32 %v1383_v56, %v1252_v58  ;;  %v1122_v35 = vsel %vm239_vm1, %v1104_v32, 0.0 }
0x1018   :  { %v1385_v3 = vpop.eup %1384 }
0x1019   :  { %v1119_v29 = vsel %vm239_vm1, %v1103_v10, 0.0  ;;  %v1106_v14 = vmul.f32 %v1385_v3, %v1252_v58 }
0x101a   :  { %v1387_v33 = vpop.eup %1386  ;;  %1120 = vadd.xlane.f32.xlu1 %v1119_v29  ;;  %1114 = vadd.xlane.f32.xlu0 %v1113_v30 }
0x101b   :  { %v1105_v25 = vmul.f32 %v1387_v33, %v1252_v58  ;;  %v1128_v51 = vsel %vm239_vm1, %v1106_v14, 0.0  ;;  %v1398_v58 = vmov 3  }
0x101d   :  { %v1125_v34 = vsel %vm239_vm1, %v1105_v25, 0.0 }
0x101e   :  { %1126 = vadd.xlane.f32.xlu1 %v1125_v34  ;;  %1123 = vadd.xlane.f32.xlu0 %v1122_v35 }
0x1022   :  { %1129 = vadd.xlane.f32.xlu0 %v1128_v51 }
0x1099   :  { %v1112_v21 = vpop.xlane.xlu1 %1111 }
0x109b   :  { %v1109_v22 = vpop.xlane.xlu0 %1108 }
0x109c   :  { %v1132_v37 = vsel %vm1131_vm3, %v1109_v22, %v1112_v21 }
0x109f   :  { %v1118_v52 = vpop.xlane.xlu0 %1117 }
0x10a3   :  { %v1121_v38 = vpop.xlane.xlu1 %1120  ;;  %v1115_v39 = vpop.xlane.xlu0 %1114 }
0x10a4   :  { %v1134_v41 = vsel %vm1133_vm4, %v1132_v37, %v1115_v39 }
0x10a5   :  { %v1136_v44 = vsel %vm1135_vm5, %v1134_v41, %v1118_v52 }
0x10a6   :  { %v1138_v45 = vsel %vm1137_vm6, %v1136_v44, %v1121_v38 }
0x10a7   :  { %v1124_v46 = vpop.xlane.xlu0 %1123  ;;  %v1127_v47 = vpop.xlane.xlu1 %1126 }
0x10a8   :  { %v1140_v48 = vsel %vm1139_vm7, %v1138_v45, %v1124_v46 }
0x10a9   :  { %v1142_v62 = vsel %vm1141_vm8, %v1140_v48, %v1127_v47 }
0x10ab   :  { %v1130_v0 = vpop.xlane.xlu0 %1129 }
0x10ac   :  { %v1144_v43 = vsel %vm1143_vm9, %v1142_v62, %v1130_v0 }
0x10ad   :  { %v1146_v4 = vadd.f32 %v1145_v42, %v1144_v43 }
0x10af   :  { %v1148_v5 = vsel %vm1147_vm10, %v1146_v4, -inf }
0x10b0   :  { %1149 = vmax.xlane.f32.xlu1 %v1148_v5 }
0x1139   :  { %v1150_v60 = vpop.xlane.xlu1 %1149 }
0x113a   :  { %v1151_v6 = vsub.f32 %v1146_v4, %v1150_v60 }
0x113c   :  { %v1152_v7 = vmul.f32 1.442695, %v1151_v6 }
0x113e   :  { %1388 = vpow2.f32 %v1152_v7 }
0x114b   :  { %v1389_v8 = vpop.eup %1388 }
0x114c   :  { %v1154_v26 = vsel %vm1147_vm10, %v1389_v8, 0.0 }
0x114d   :  { %1155 = vadd.xlane.f32.xlu0 %v1154_v26 }
0x11d6   :  { %v1156_v9 = vpop.xlane.xlu0 %1155 }
0x11d7   :  { %1390 = vrcp.f32 %v1156_v9 }
0x11e4   :  { %v1391_v11 = vpop.eup %1390 }
0x11e5   :  { %v1158_v12 = vmul.f32 %v1391_v11, %v1389_v8 }
0x11e7   :  { %1166 = vperm.xlu0 %1316, %v1158_v12   ;;  %1161 = vperm.xlu1 %1315, %v1158_v12  }
0x11eb   :  { %1317 = vset.pattern.permute.xlu1 %v1396_v15  ;;  %1323 = vset.pattern.permute.xlu0 %v1397_v13 }
0x11ec   :  { %1172 = vperm.xlu1 %1317, %v1158_v12  }
0x11f0   :  { %1318 = vset.pattern.permute.xlu1 %v1398_v58 }
0x11f1   :  { %1178 = vperm.xlu1 %1318, %v1158_v12  }
0x11f5   :  { %1319 = vset.pattern.permute.xlu1 %v1399_v16 }
0x11f6   :  { %1184 = vperm.xlu1 %1319, %v1158_v12  }
0x11fa   :  { %1320 = vset.pattern.permute.xlu1 %v1400_v17 }
0x11fb   :  { %1190 = vperm.xlu1 %1320, %v1158_v12  }
0x11ff   :  { %1321 = vset.pattern.permute.xlu1 %v1401_v49 }
0x1200   :  { %1196 = vperm.xlu1 %1321, %v1158_v12  }
0x1204   :  { %1322 = vset.pattern.permute.xlu1 %v1397_v13 }
0x1205   :  { %1202 = vperm.xlu1 %1322, %v1158_v12  }
0x1209   :  { %1207 = vrot.lane.b32.xlu1 %v1158_v12, %s1393_s15 }
0x1262   :  { %v1162_v18 = vpop.permute.xlu1 %1161  ;;  %v1167_v23 = vpop.permute.xlu0 %1166 }
0x1263   :  { %v1169_v24 = vmul.f32 %v1167_v23, %v1834_v27  ;;  %v1164_v50 = vmul.f32 %v1162_v18, %v1879_v59 }
0x1265   :  { %v1170_v55 = vadd.f32 %v1169_v24, %v1164_v50 }
0x1267   :  { %v1173_v19 = vpop.permute.xlu1 %1172 }
0x1268   :  { %v1175_v40 = vmul.f32 %v1173_v19, %v1813_v1 }
0x126a   :  { %v1176_v10 = vadd.f32 %v1175_v40, %v1170_v55 }
0x126c   :  { %v1179_v20 = vpop.permute.xlu1 %1178 }
0x126d   :  { %v1181_v56 = vmul.f32 %v1179_v20, %v1777_v61 }
0x126f   :  { %v1182_v29 = vadd.f32 %v1181_v56, %v1176_v10 }
0x1271   :  { %v1185_v36 = vpop.permute.xlu1 %1184 }
0x1272   :  { %v1187_v3 = vmul.f32 %v1185_v36, %v1781_v28 }
0x1274   :  { %v1188_v33 = vadd.f32 %v1187_v3, %v1182_v29 }
0x1276   :  { %v1191_v53 = vpop.permute.xlu1 %1190 }
0x1277   :  { %v1193_v30 = vmul.f32 %v1191_v53, %v1818_v2 }
0x1279   :  { %v1194_v34 = vadd.f32 %v1193_v30, %v1188_v33 }
0x127b   :  { %v1197_v32 = vpop.permute.xlu1 %1196 }
0x127c   :  { %v1199_v25 = vmul.f32 %v1197_v32, %v1839_v31 }
0x127e   :  { %v1200_v35 = vadd.f32 %v1199_v25, %v1194_v34 }
0x1280   :  { %v1203_v27 = vpop.permute.xlu1 %1202 }
0x1281   :  { %v1205_v59 = vmul.f32 %v1203_v27, %v1898_v63 }
0x1283   :  { %v1206_v1 = vadd.f32 %v1205_v59, %v1200_v35 }
0x1284   :  { %v1208_v14 = vpop.permute.xlu1 %1207 }
0x1285   :  { %v1210_v61 = vsel %vm239_vm1, %v1206_v1, %v1208_v14 }
0x1286   :  { %v1212_v51 = vsel %vm1211_vm11, %v1210_v61, 0.0 }
0x1287   :  { %1213 = vst [vmem:[%s1936_s4] sm:$0xff] %v1212_v51 }

</bundles_post_ra>
